<compile_context>
chip_gen: v6e
topology: v6e:2x2x1
jax: 0.10.0
libtpu: 0.0.40
codegen_flags: <defaults>
</compile_context>

<pallas_src>
import functools

import jax
import jax.numpy as jnp
from jax.experimental import pallas as pl
from jax.experimental.pallas import tpu as pltpu

HIDDEN = 768      # transformer hidden size (fc1 = Linear(768*len([-1]), 512))
FC1_OUT = 512
LN_DIM = 1024     # LayerNorm(512 * 2)
FC2_OUT = 128
TASK_OUT = 4      # Task2Model.fc1 = Linear(128, 4)
HEAD_PAD = 128    # lane-dense padding of the 4-wide head
LN_EPS = 1e-5

B_TILE = 8        # sublane-aligned batch tile (shrunk to B when B < 8)


def _task2_kernel(hidden_ref, attn_ref, w1_ref, w2p_ref, w2a_ref, w3p_ref, sp_ref,
                  out_ref, acc_ref, *, inv_seq_len, s_tile, tail_valid):
    s = pl.program_id(1)
    last = pl.num_programs(1) - 1

    @pl.when(s == 0)
    def _():
        acc_ref[...] = jnp.zeros_like(acc_ref)

    # --- ModelBase: mean over the sequence dim (sum accumulated in f32) ------
    # Hot loop stays a bare cast+add; the mask exists only on the ragged tail
    # tile (static Python branch -> no extra VPU work on full tiles).
    if tail_valid == s_tile:
        acc_ref[...] += jnp.sum(hidden_ref[...].astype(jnp.float32), axis=1)
    else:
        @pl.when(s != last)
        def _():
            acc_ref[...] += jnp.sum(hidden_ref[...].astype(jnp.float32), axis=1)

        @pl.when(s == last)
        def _():
            x = hidden_ref[...].astype(jnp.float32)
            mask = jax.lax.broadcasted_iota(jnp.int32, x.shape, 1) < tail_valid
            acc_ref[...] += jnp.sum(jnp.where(mask, x, 0.0), axis=1)

    @pl.when(s == last)
    def _():
        # unpack the small-parameter block: [b1 | gamma_p | beta_p | gamma_a |
        #                                    beta_a | b2(128) | b3(128) | 0]
        sp = sp_ref[...]                                 # (8, 512) f32
        b1 = sp[0:1, :]
        gp = sp[1:2, :]
        bp = sp[2:3, :]
        ga = sp[3:4, :]
        ba = sp[4:5, :]
        b2 = sp[5:6, :FC2_OUT]
        b3 = sp[6:7, :HEAD_PAD]

        mean_pooled = acc_ref[...] * inv_seq_len                         # [Bt, 768]

        # pooled_embed = dropout(relu(fc1(mean_pooled)))  (dropout = identity)
        # bf16 x bf16 -> f32 accumulate is the MXU-native path.
        pooled = jnp.maximum(
            jnp.dot(mean_pooled.astype(jnp.bfloat16), w1_ref[...],
                    preferred_element_type=jnp.float32) + b1,
            0.0)                                                         # [Bt, 512]

        attn = attn_ref[...].astype(jnp.float32)                         # [Bt, 512]

        # LayerNorm(1024) over the virtual concat [pooled | attn], computed
        # from the two halves' partial sums (no concatenation materialized).
        # NOTE: padded batch rows give var=0 -> rsqrt(eps): finite, sliced away.
        sum_all = (jnp.sum(pooled, axis=-1, keepdims=True)
                   + jnp.sum(attn, axis=-1, keepdims=True))
        mu = sum_all * (1.0 / LN_DIM)
        dp = pooled - mu
        da = attn - mu
        var = (jnp.sum(dp * dp, axis=-1, keepdims=True)
               + jnp.sum(da * da, axis=-1, keepdims=True)) * (1.0 / LN_DIM)
        inv_std = jax.lax.rsqrt(var + LN_EPS)
        norm_p = dp * inv_std * gp + bp                                  # [Bt, 512]
        norm_a = da * inv_std * ga + ba                                  # [Bt, 512]

        # relu(fc2(concat)) == relu(norm_p @ w2_pool + norm_a @ w2_attn + b2)
        feat = jnp.maximum(
            jnp.dot(norm_p, w2p_ref[...], preferred_element_type=jnp.float32)
            + jnp.dot(norm_a, w2a_ref[...], preferred_element_type=jnp.float32)
            + b2, 0.0)                                                   # [Bt, 128]

        # --- Task2Model head: relu(fc1(dropout(feat))); head padded to 128 ---
        out = jnp.maximum(
            jnp.dot(feat, w3_ref_full := w3p_ref[...],
                    preferred_element_type=jnp.float32) + b3, 0.0)       # [Bt, 128]
        out_ref[...] = out.astype(out_ref.dtype)


def task2_forward(hidden, attn_embed, params, *, s_tile_max=512,
                  vmem_limit_bytes=48 << 20):
    """hidden: [B, S, 768] (native dtype, streamed as-is); attn_embed: [B, 512].
    Returns the Task2Model output [B, 4] in f32."""
    B, S, D = hidden.shape
    assert D == HIDDEN
    (w1, b1, gamma, beta, w2, b2, w3, b3) = params

    # Split LayerNorm / fc2 params into the pooled / attention halves
    # (eliminates the in-kernel concatenation).  Assumes concat order
    # [pooled_embed | attention_embed] as in the PyTorch module.
    gp, ga = gamma[:, :FC1_OUT], gamma[:, FC1_OUT:]
    bp, ba = beta[:, :FC1_OUT], beta[:, FC1_OUT:]
    w2p, w2a = w2[:FC1_OUT, :], w2[FC1_OUT:, :]

    # Pad the 4-wide head to a lane-dense 128 columns (unmasked stores).
    w3p = jnp.zeros((FC2_OUT, HEAD_PAD), jnp.float32).at[:, :TASK_OUT].set(w3)

    # Pack the seven tiny bias/affine vectors into a single (8, 512) block.
    sp = jnp.zeros((8, FC1_OUT), jnp.float32)
    sp = sp.at[0, :].set(b1.reshape(-1))
    sp = sp.at[1, :].set(gp.reshape(-1))
    sp = sp.at[2, :].set(bp.reshape(-1))
    sp = sp.at[3, :].set(ga.reshape(-1))
    sp = sp.at[4, :].set(ba.reshape(-1))
    sp = sp.at[5, :FC2_OUT].set(b2.reshape(-1))
    sp = sp.at[6, :TASK_OUT].set(b3.reshape(-1))

    # Only big weight -> bf16 in VMEM (halves resident weight footprint; the
    # fc1 matmul accumulates in f32 via preferred_element_type).
    w1_bf = w1.astype(jnp.bfloat16)

    # Tiling: never pad/copy `hidden`.  Ragged last sequence tile is masked in
    # the kernel; a ragged last batch tile only dirties output rows >= B which
    # are sliced away.
    b_tile = B_TILE if B >= B_TILE else B
    b_blocks = pl.cdiv(B, b_tile)
    s_tile = s_tile_max if S >= s_tile_max else S
    n_s = pl.cdiv(S, s_tile)
    tail_valid = S - (n_s - 1) * s_tile

    b_pad = b_blocks * b_tile
    attn_p = attn_embed.astype(jnp.float32)
    if b_pad != B:                                  # tiny: only the [B,512] input
        attn_p = jnp.pad(attn_p, ((0, b_pad - B), (0, 0)))

    kernel = functools.partial(_task2_kernel, inv_seq_len=1.0 / S,
                               s_tile=s_tile, tail_valid=tail_valid)

    hidden_bytes = hidden.size * hidden.dtype.itemsize
    weight_bytes = (w1_bf.size * 2
                    + (w2p.size + w2a.size + w3p.size + sp.size + attn_p.size) * 4)
    cost = pl.CostEstimate(
        flops=2 * B * (HIDDEN * FC1_OUT + LN_DIM * FC2_OUT + FC2_OUT * HEAD_PAD)
              + 2 * B * S * HIDDEN,
        transcendentals=B,
        bytes_accessed=hidden_bytes + weight_bytes + b_pad * HEAD_PAD * 4)

    def const(shape):
        # VMEM-resident across all grid steps (constant block index).
        return pl.BlockSpec(shape, lambda b, s: (0, 0))

    out = pl.pallas_call(
        kernel,
        out_shape=jax.ShapeDtypeStruct((b_pad, HEAD_PAD), jnp.float32),
        grid=(b_blocks, n_s),
        in_specs=[
            pl.BlockSpec((b_tile, s_tile, HIDDEN), lambda b, s: (b, s, 0)),
            pl.BlockSpec((b_tile, FC1_OUT), lambda b, s: (b, 0)),
            const((HIDDEN, FC1_OUT)),      # w1 (bf16)
            const((FC1_OUT, FC2_OUT)),     # w2_pool
            const((FC1_OUT, FC2_OUT)),     # w2_attn
            const((FC2_OUT, HEAD_PAD)),    # w3 (padded)
            const((8, FC1_OUT)),           # packed biases / LN affine params
        ],
        out_specs=pl.BlockSpec((b_tile, HEAD_PAD), lambda b, s: (b, 0)),
        scratch_shapes=[pltpu.VMEM((b_tile, HIDDEN), jnp.float32)],
        compiler_params=pltpu.CompilerParams(
            dimension_semantics=("parallel", "arbitrary"),
            vmem_limit_bytes=vmem_limit_bytes),
        cost_estimate=cost,
    )(hidden, attn_p, w1_bf, w2p, w2a, w3p, sp)

    return out[:B, :TASK_OUT]


def task2_reference(hidden, attn_embed, params):
    (w1, b1, gamma, beta, w2, b2, w3, b3) = params
    mean_pooled = jnp.mean(hidden.astype(jnp.float32), axis=1)
    pooled = jnp.maximum(mean_pooled @ w1 + b1, 0.0)
    cat = jnp.concatenate([pooled, attn_embed.astype(jnp.float32)], axis=1)
    mu = jnp.mean(cat, axis=-1, keepdims=True)
    var = jnp.mean((cat - mu) ** 2, axis=-1, keepdims=True)
    normed = (cat - mu) * jax.lax.rsqrt(var + LN_EPS) * gamma + beta
    feat = jnp.maximum(normed @ w2 + b2, 0.0)
    return jnp.maximum(feat @ w3 + b3, 0.0)


if __name__ == "__main__":
    key = jax.random.PRNGKey(0)
    B, S = 2, 8

    ks = jax.random.split(key, 10)
    # deterministic synthetic parameters (shapes dictated by the module __init__)
    w1 = jax.random.normal(ks[0], (HIDDEN, FC1_OUT), jnp.float32) * 0.02
    b1 = jax.random.normal(ks[1], (1, FC1_OUT), jnp.float32) * 0.02
    gamma = 1.0 + jax.random.normal(ks[2], (1, LN_DIM), jnp.float32) * 0.02
    beta = jax.random.normal(ks[3], (1, LN_DIM), jnp.float32) * 0.02
    w2 = jax.random.normal(ks[4], (LN_DIM, FC2_OUT), jnp.float32) * 0.02
    b2 = jax.random.normal(ks[5], (1, FC2_OUT), jnp.float32) * 0.02
    w3 = jax.random.normal(ks[6], (FC2_OUT, TASK_OUT), jnp.float32) * 0.02
    b3 = jax.random.normal(ks[7], (1, TASK_OUT), jnp.float32) * 0.02
    params = (w1, b1, gamma, beta, w2, b2, w3, b3)

    # synthetic transformer outputs; hidden comes from the producer in bf16 and
    # is streamed as-is (no wrapper cast/pad); compute stays f32 in-kernel.
    hidden = jax.random.normal(ks[8], (B, S, HIDDEN), jnp.float32).astype(jnp.bfloat16)
    attn_embed = jax.random.normal(ks[9], (B, FC1_OUT), jnp.float32)

    out = jax.block_until_ready(task2_forward(hidden, attn_embed, params))
    ref = jax.block_until_ready(task2_reference(hidden, attn_embed, params))

    assert out.shape == (B, TASK_OUT), out.shape
    # tolerance covers bf16 hidden + bf16 fc1 weights vs the pure-f32 reference
    assert jnp.allclose(out, ref, atol=2e-3, rtol=2e-3), (out, ref)
    print("KERNEL_OK")
</pallas_src>

<mosaic_0001>
module attributes {stable_mosaic.version = 11 : i64} {
  func.func @_task2_kernel(%arg0: i32, %arg1: i32, %arg2: memref<2x8x768xbf16, #tpu.memory_space<vmem>>, %arg3: memref<2x512xf32, #tpu.memory_space<vmem>>, %arg4: memref<768x512xbf16, #tpu.memory_space<vmem>>, %arg5: memref<512x128xf32, #tpu.memory_space<vmem>>, %arg6: memref<512x128xf32, #tpu.memory_space<vmem>>, %arg7: memref<128x128xf32, #tpu.memory_space<vmem>>, %arg8: memref<8x512xf32, #tpu.memory_space<vmem>>, %arg9: memref<2x128xf32, #tpu.memory_space<vmem>>, %arg10: memref<2x768xf32, #tpu.memory_space<vmem>>) attributes {dimension_semantics = [#tpu.dimension_semantics<parallel>, #tpu.dimension_semantics<arbitrary>], iteration_bounds = array<i64: 1, 1>, scalar_prefetch = 0 : i64, scratch_operands = 1 : i64, tpu.core_type = #tpu.core_type<tc>, window_params = [{transform_indices = @transform_0, window_bounds = array<i64: 2, 8, 768>}, {transform_indices = @transform_1, window_bounds = array<i64: 2, 512>}, {pipeline_mode = #tpu.pipeline_mode<synchronous>, transform_indices = @transform_2, window_bounds = array<i64: 768, 512>}, {pipeline_mode = #tpu.pipeline_mode<synchronous>, transform_indices = @transform_3, window_bounds = array<i64: 512, 128>}, {pipeline_mode = #tpu.pipeline_mode<synchronous>, transform_indices = @transform_4, window_bounds = array<i64: 512, 128>}, {pipeline_mode = #tpu.pipeline_mode<synchronous>, transform_indices = @transform_5, window_bounds = array<i64: 128, 128>}, {pipeline_mode = #tpu.pipeline_mode<synchronous>, transform_indices = @transform_6, window_bounds = array<i64: 8, 512>}, {transform_indices = @transform_7, window_bounds = array<i64: 2, 128>}]} {
    %c0_i32 = arith.constant 0 : i32
    %0 = arith.cmpi eq, %arg1, %c0_i32 : i32
    %1 = arith.extui %0 : i1 to i32
    %c0_i32_0 = arith.constant 0 : i32
    %2 = arith.cmpi ne, %1, %c0_i32_0 : i32
    scf.if %2 {
      %cst_9 = arith.constant 0.000000e+00 : f32
      %12 = vector.broadcast %cst_9 : f32 to vector<2x768xf32>
      %c0_10 = arith.constant 0 : index
      %c0_11 = arith.constant 0 : index
      %13 = vector.load %arg10[%c0_10, %c0_11] : memref<2x768xf32, #tpu.memory_space<vmem>>, vector<2x768xf32>
      tpu.vector_store %arg10[%c0_10, %c0_11], %12 {strides = array<i32>} : memref<2x768xf32, #tpu.memory_space<vmem>>, vector<2x768xf32>,
    } else {
    }
    %c0 = arith.constant 0 : index
    %c0_1 = arith.constant 0 : index
    %3 = vector.load %arg10[%c0, %c0_1] : memref<2x768xf32, #tpu.memory_space<vmem>>, vector<2x768xf32>
    %c0_2 = arith.constant 0 : index
    %c0_3 = arith.constant 0 : index
    %c0_4 = arith.constant 0 : index
    %4 = vector.load %arg2[%c0_2, %c0_3, %c0_4] : memref<2x8x768xbf16, #tpu.memory_space<vmem>>, vector<2x8x768xbf16>
    %5 = arith.extf %4 : vector<2x8x768xbf16> to vector<2x8x768xf32>
    %cst = arith.constant dense<0.000000e+00> : vector<2x768xf32>
    %6 = vector.multi_reduction <add>, %5, %cst [1] : vector<2x8x768xf32> to vector<2x768xf32>
    %7 = arith.addf %3, %6 : vector<2x768xf32>
    %c0_5 = arith.constant 0 : index
    %c0_6 = arith.constant 0 : index
    %8 = vector.load %arg10[%c0_5, %c0_6] : memref<2x768xf32, #tpu.memory_space<vmem>>, vector<2x768xf32>
    tpu.vector_store %arg10[%c0_5, %c0_6], %7 {strides = array<i32>} : memref<2x768xf32, #tpu.memory_space<vmem>>, vector<2x768xf32>,
    %c0_i32_7 = arith.constant 0 : i32
    %9 = arith.cmpi eq, %arg1, %c0_i32_7 : i32
    %10 = arith.extui %9 : i1 to i32
    %c0_i32_8 = arith.constant 0 : i32
    %11 = arith.cmpi ne, %10, %c0_i32_8 : i32
    scf.if %11 {
      %c0_9 = arith.constant 0 : index
      %c0_10 = arith.constant 0 : index
      %12 = vector.load %arg8[%c0_9, %c0_10] : memref<8x512xf32, #tpu.memory_space<vmem>>, vector<8x512xf32>
      %13 = vector.extract_strided_slice %12 {offsets = [0, 0], sizes = [1, 512], strides = [1, 1]} : vector<8x512xf32> to vector<1x512xf32>
      %14 = vector.extract_strided_slice %12 {offsets = [1, 0], sizes = [1, 512], strides = [1, 1]} : vector<8x512xf32> to vector<1x512xf32>
      %15 = vector.extract_strided_slice %12 {offsets = [2, 0], sizes = [1, 512], strides = [1, 1]} : vector<8x512xf32> to vector<1x512xf32>
      %16 = vector.extract_strided_slice %12 {offsets = [3, 0], sizes = [1, 512], strides = [1, 1]} : vector<8x512xf32> to vector<1x512xf32>
      %17 = vector.extract_strided_slice %12 {offsets = [4, 0], sizes = [1, 512], strides = [1, 1]} : vector<8x512xf32> to vector<1x512xf32>
      %18 = vector.extract_strided_slice %12 {offsets = [5, 0], sizes = [1, 128], strides = [1, 1]} : vector<8x512xf32> to vector<1x128xf32>
      %19 = vector.extract_strided_slice %12 {offsets = [6, 0], sizes = [1, 128], strides = [1, 1]} : vector<8x512xf32> to vector<1x128xf32>
      %c0_11 = arith.constant 0 : index
      %c0_12 = arith.constant 0 : index
      %20 = vector.load %arg10[%c0_11, %c0_12] : memref<2x768xf32, #tpu.memory_space<vmem>>, vector<2x768xf32>
      %cst_13 = arith.constant 1.250000e-01 : f32
      %21 = vector.broadcast %cst_13 : f32 to vector<2x768xf32>
      %22 = arith.mulf %20, %21 : vector<2x768xf32>
      %23 = arith.truncf %22 : vector<2x768xf32> to vector<2x768xbf16>
      %c0_14 = arith.constant 0 : index
      %c0_15 = arith.constant 0 : index
      %24 = vector.load %arg4[%c0_14, %c0_15] : memref<768x512xbf16, #tpu.memory_space<vmem>>, vector<768x512xbf16>
      %cst_16 = arith.constant dense<0.000000e+00> : vector<2x512xf32>
      %25 = tpu.matmul %23, %24, %cst_16 {dimension_numbers = #tpu.dot_dimension_numbers<[1], [0], [0], [1], [0, 0, 1, 1], [], []>} : vector<2x768xbf16>, vector<768x512xbf16>, vector<2x512xf32> -> vector<2x512xf32>
      %26 = vector.broadcast %13 : vector<1x512xf32> to vector<2x512xf32>
      %27 = arith.addf %25, %26 : vector<2x512xf32>
      %cst_17 = arith.constant 0.000000e+00 : f32
      %28 = vector.broadcast %cst_17 : f32 to vector<2x512xf32>
      %29 = arith.maximumf %27, %28 : vector<2x512xf32>
      %c0_18 = arith.constant 0 : index
      %c0_19 = arith.constant 0 : index
      %30 = vector.load %arg3[%c0_18, %c0_19] : memref<2x512xf32, #tpu.memory_space<vmem>>, vector<2x512xf32>
      %cst_20 = arith.constant dense<0.000000e+00> : vector<2xf32>
      %31 = vector.multi_reduction <add>, %29, %cst_20 [1] : vector<2x512xf32> to vector<2xf32>
      %32 = vector.shape_cast %31 : vector<2xf32> to vector<2x1xf32>
      %cst_21 = arith.constant dense<0.000000e+00> : vector<2xf32>
      %33 = vector.multi_reduction <add>, %30, %cst_21 [1] : vector<2x512xf32> to vector<2xf32>
      %34 = vector.shape_cast %33 : vector<2xf32> to vector<2x1xf32>
      %35 = arith.addf %32, %34 : vector<2x1xf32>
      %cst_22 = arith.constant 9.765625E-4 : f32
      %36 = vector.broadcast %cst_22 : f32 to vector<2x1xf32>
      %37 = arith.mulf %35, %36 : vector<2x1xf32>
      %38 = vector.broadcast %37 : vector<2x1xf32> to vector<2x512xf32>
      %39 = arith.subf %29, %38 : vector<2x512xf32>
      %40 = vector.broadcast %37 : vector<2x1xf32> to vector<2x512xf32>
      %41 = arith.subf %30, %40 : vector<2x512xf32>
      %42 = arith.mulf %39, %39 : vector<2x512xf32>
      %cst_23 = arith.constant dense<0.000000e+00> : vector<2xf32>
      %43 = vector.multi_reduction <add>, %42, %cst_23 [1] : vector<2x512xf32> to vector<2xf32>
      %44 = vector.shape_cast %43 : vector<2xf32> to vector<2x1xf32>
      %45 = arith.mulf %41, %41 : vector<2x512xf32>
      %cst_24 = arith.constant dense<0.000000e+00> : vector<2xf32>
      %46 = vector.multi_reduction <add>, %45, %cst_24 [1] : vector<2x512xf32> to vector<2xf32>
      %47 = vector.shape_cast %46 : vector<2xf32> to vector<2x1xf32>
      %48 = arith.addf %44, %47 : vector<2x1xf32>
      %cst_25 = arith.constant 9.765625E-4 : f32
      %49 = vector.broadcast %cst_25 : f32 to vector<2x1xf32>
      %50 = arith.mulf %48, %49 : vector<2x1xf32>
      %cst_26 = arith.constant 9.99999974E-6 : f32
      %51 = vector.broadcast %cst_26 : f32 to vector<2x1xf32>
      %52 = arith.addf %50, %51 : vector<2x1xf32>
      %53 = math.rsqrt %52 : vector<2x1xf32>
      %54 = vector.broadcast %53 : vector<2x1xf32> to vector<2x512xf32>
      %55 = arith.mulf %39, %54 : vector<2x512xf32>
      %56 = vector.broadcast %14 : vector<1x512xf32> to vector<2x512xf32>
      %57 = arith.mulf %55, %56 : vector<2x512xf32>
      %58 = vector.broadcast %15 : vector<1x512xf32> to vector<2x512xf32>
      %59 = arith.addf %57, %58 : vector<2x512xf32>
      %60 = vector.broadcast %53 : vector<2x1xf32> to vector<2x512xf32>
      %61 = arith.mulf %41, %60 : vector<2x512xf32>
      %62 = vector.broadcast %16 : vector<1x512xf32> to vector<2x512xf32>
      %63 = arith.mulf %61, %62 : vector<2x512xf32>
      %64 = vector.broadcast %17 : vector<1x512xf32> to vector<2x512xf32>
      %65 = arith.addf %63, %64 : vector<2x512xf32>
      %c0_27 = arith.constant 0 : index
      %c0_28 = arith.constant 0 : index
      %66 = vector.load %arg5[%c0_27, %c0_28] : memref<512x128xf32, #tpu.memory_space<vmem>>, vector<512x128xf32>
      %cst_29 = arith.constant dense<0.000000e+00> : vector<2x128xf32>
      %67 = tpu.matmul %59, %66, %cst_29 {dimension_numbers = #tpu.dot_dimension_numbers<[1], [0], [0], [1], [0, 0, 1, 1], [], []>} : vector<2x512xf32>, vector<512x128xf32>, vector<2x128xf32> -> vector<2x128xf32>
      %c0_30 = arith.constant 0 : index
      %c0_31 = arith.constant 0 : index
      %68 = vector.load %arg6[%c0_30, %c0_31] : memref<512x128xf32, #tpu.memory_space<vmem>>, vector<512x128xf32>
      %cst_32 = arith.constant dense<0.000000e+00> : vector<2x128xf32>
      %69 = tpu.matmul %65, %68, %cst_32 {dimension_numbers = #tpu.dot_dimension_numbers<[1], [0], [0], [1], [0, 0, 1, 1], [], []>} : vector<2x512xf32>, vector<512x128xf32>, vector<2x128xf32> -> vector<2x128xf32>
      %70 = arith.addf %67, %69 : vector<2x128xf32>
      %71 = vector.broadcast %18 : vector<1x128xf32> to vector<2x128xf32>
      %72 = arith.addf %70, %71 : vector<2x128xf32>
      %cst_33 = arith.constant 0.000000e+00 : f32
      %73 = vector.broadcast %cst_33 : f32 to vector<2x128xf32>
      %74 = arith.maximumf %72, %73 : vector<2x128xf32>
      %c0_34 = arith.constant 0 : index
      %c0_35 = arith.constant 0 : index
      %75 = vector.load %arg7[%c0_34, %c0_35] : memref<128x128xf32, #tpu.memory_space<vmem>>, vector<128x128xf32>
      %cst_36 = arith.constant dense<0.000000e+00> : vector<2x128xf32>
      %76 = tpu.matmul %74, %75, %cst_36 {dimension_numbers = #tpu.dot_dimension_numbers<[1], [0], [0], [1], [0, 0, 1, 1], [], []>} : vector<2x128xf32>, vector<128x128xf32>, vector<2x128xf32> -> vector<2x128xf32>
      %77 = vector.broadcast %19 : vector<1x128xf32> to vector<2x128xf32>
      %78 = arith.addf %76, %77 : vector<2x128xf32>
      %cst_37 = arith.constant 0.000000e+00 : f32
      %79 = vector.broadcast %cst_37 : f32 to vector<2x128xf32>
      %80 = arith.maximumf %78, %79 : vector<2x128xf32>
      %c0_38 = arith.constant 0 : index
      %c0_39 = arith.constant 0 : index
      %81 = vector.load %arg9[%c0_38, %c0_39] : memref<2x128xf32, #tpu.memory_space<vmem>>, vector<2x128xf32>
      tpu.vector_store %arg9[%c0_38, %c0_39], %80 {strides = array<i32>} : memref<2x128xf32, #tpu.memory_space<vmem>>, vector<2x128xf32>,
    } else {
    }
    return
  }
  func.func @transform_0(%arg0: i32, %arg1: i32) -> (i32, i32, i32) {
    %c0_i32 = arith.constant 0 : i32
    %c0_i32_0 = arith.constant 0 : i32
    return %arg0, %arg1, %c0_i32 : i32, i32, i32
  }
  func.func @transform_1(%arg0: i32, %arg1: i32) -> (i32, i32) {
    %c0_i32 = arith.constant 0 : i32
    %c0_i32_0 = arith.constant 0 : i32
    return %arg0, %c0_i32 : i32, i32
  }
  func.func @transform_2(%arg0: i32, %arg1: i32) -> (i32, i32) {
    %c0_i32 = arith.constant 0 : i32
    %c0_i32_0 = arith.constant 0 : i32
    %c0_i32_1 = arith.constant 0 : i32
    return %c0_i32, %c0_i32_0 : i32, i32
  }
  func.func @transform_3(%arg0: i32, %arg1: i32) -> (i32, i32) {
    %c0_i32 = arith.constant 0 : i32
    %c0_i32_0 = arith.constant 0 : i32
    %c0_i32_1 = arith.constant 0 : i32
    return %c0_i32, %c0_i32_0 : i32, i32
  }
  func.func @transform_4(%arg0: i32, %arg1: i32) -> (i32, i32) {
    %c0_i32 = arith.constant 0 : i32
    %c0_i32_0 = arith.constant 0 : i32
    %c0_i32_1 = arith.constant 0 : i32
    return %c0_i32, %c0_i32_0 : i32, i32
  }
  func.func @transform_5(%arg0: i32, %arg1: i32) -> (i32, i32) {
    %c0_i32 = arith.constant 0 : i32
    %c0_i32_0 = arith.constant 0 : i32
    %c0_i32_1 = arith.constant 0 : i32
    return %c0_i32, %c0_i32_0 : i32, i32
  }
  func.func @transform_6(%arg0: i32, %arg1: i32) -> (i32, i32) {
    %c0_i32 = arith.constant 0 : i32
    %c0_i32_0 = arith.constant 0 : i32
    %c0_i32_1 = arith.constant 0 : i32
    return %c0_i32, %c0_i32_0 : i32, i32
  }
  func.func @transform_7(%arg0: i32, %arg1: i32) -> (i32, i32) {
    %c0_i32 = arith.constant 0 : i32
    %c0_i32_0 = arith.constant 0 : i32
    return %arg0, %c0_i32 : i32, i32
  }
}

</mosaic_0001>

<bundles_post_ra>
// kernel: tpu_custom_call.1
= control target key start
LH: loop header
LB: loop body
LE: loop exit
PB: predicated region body
PF: predicated region fallthrough
CT: control target
= control target key end

     0   :  { %12 = vsyncpa [#allocation4], 0  ;;  %s3682_s0 = inlined_call_operand.hbm [shape: bf16[2,8,768], index: 0, kind: input, shape index: {}]   ;;  %s3683_s1 = inlined_call_operand.hbm [shape: f32[2,512], index: 1, kind: input, shape index: {}]   ;;  %s3684_s2 = inlined_call_operand.hbm [shape: bf16[768,512], index: 2, kind: input, shape index: {}]   ;;  %s3685_s3 = inlined_call_operand.hbm [shape: f32[512,128], index: 3, kind: input, shape index: {}]   ;;  %s3686_s4 = inlined_call_operand.hbm [shape: f32[512,128], index: 4, kind: input, shape index: {}]   ;;  %s3687_s5 = inlined_call_operand.hbm [shape: f32[128,128], index: 5, kind: input, shape index: {}]   ;;  %s3688_s6 = inlined_call_operand.hbm [shape: f32[8,512], index: 6, kind: input, shape index: {}]   ;;  %s3689_s7 = inlined_call_operand.hbm [shape: f32[2,128], index: 7, kind: output, shape index: {}]  }
   0x1   :  { %13 = vsyncpa [#allocation7], 0 }
   0x2   :  { %14 = vsyncpa [#allocation10], 0 }
   0x3   :  { %15 = vsyncpa [#allocation13], 0 }
   0x4   :  { %16 = vsyncpa [#allocation5], 0  ;;  %s3420_s24 = smov [#allocation6]   ;;  %s3421_s26 = smov [#allocation9]  }
   0x5   :  { %s35_s25 = sshll.u32 %s3420_s24, 4  ;;  %s56_s27 = sshll.u32 %s3421_s26, 4  ;;  %s36_s25 = int_to_ptr.vmem [resolvable:$true] %s35_s25  ;;  %s57_s27 = int_to_ptr.vmem [resolvable:$true] %s56_s27 }
   0x6   :  { %s3258_s28 = scalar_lea.vmem %s36_s25, 128  ;;  %p3263_p1 = scmp.lt.s32.totalorder %s36_s25, %s36_s25 }
   0x7   :  { %p3259_p0 = scmp.ne.s32.totalorder %s36_s25, %s3258_s28  ;;  %p3264_p2 = scmp.lt.s32.totalorder %s3258_s28, %s3258_s28 }
   0x9   :  { %p3265_p3 = por %p3264_p2, %p3263_p1 }
   0xb   :  { %p3266_p4 = pnand %p3265_p3, %p3259_p0 }
   0xd   :  { %3269 = shalt.err (!%p3266_p4)
}
   0xe   :  { %38 = dma.hbm_to_vmem [thread:$0]  %s3683_s1, 128, %s36_s25, [#allocation7]  }
   0xf   :  { %s3278_s8 = scalar_lea.vmem %s57_s27, 8192  ;;  %p3283_p6 = scmp.lt.s32.totalorder %s57_s27, %s57_s27 }
  0x10   :  { %p3279_p5 = scmp.ne.s32.totalorder %s57_s27, %s3278_s8  ;;  %p3284_p7 = scmp.lt.s32.totalorder %s3278_s8, %s3278_s8 }
  0x12   :  { %p3285_p8 = por %p3284_p7, %p3283_p6 }
  0x14   :  { %p3286_p9 = pnand %p3285_p8, %p3279_p5 }
  0x16   :  { %3289 = shalt.err (!%p3286_p9)
}
  0x17   :  { %s3422_s9 = smov 128   ;;  %s3423_s10 = smov 8  }
  0x18   :  { %62 = dma.hbm_to_vmem [thread:$0]  %s3685_s3, 8192, %s57_s27, [#allocation10], %s3422_s9, %s3422_s9, %s3423_s10  }
  0x19   :  { %s3424_s13 = smov [#allocation12]   ;;  %s3425_s15 = smov [#allocation3]  }
  0x1a   :  { %s80_s14 = sshll.u32 %s3424_s13, 4  ;;  %s22_s1 = sshll.u32 %s3425_s15, 4  ;;  %s81_s14 = int_to_ptr.vmem [resolvable:$true] %s80_s14  ;;  %s23_s1 = int_to_ptr.vmem [resolvable:$true] %s22_s1 }
  0x1b   :  { %s3298_s16 = scalar_lea.vmem %s81_s14, 2048  ;;  %p3303_p11 = scmp.lt.s32.totalorder %s81_s14, %s81_s14 }
  0x1c   :  { %p3299_p10 = scmp.ne.s32.totalorder %s81_s14, %s3298_s16  ;;  %p3304_p12 = scmp.lt.s32.totalorder %s3298_s16, %s3298_s16 }
  0x1e   :  { %p3305_p13 = por %p3304_p12, %p3303_p11 }
  0x20   :  { %p3306_p0 = pnand %p3305_p13, %p3299_p10 }
  0x22   :  { %3309 = shalt.err (!%p3306_p0)
}
  0x23   :  { %86 = dma.hbm_to_vmem [thread:$0]  %s3687_s5, 2048, %s81_s14, [#allocation13], %s3422_s9, %s3422_s9, %s3423_s10  }
  0x24   :  { %s3318_s3 = scalar_lea.vmem %s23_s1, 768  ;;  %p3323_p2 = scmp.lt.s32.totalorder %s23_s1, %s23_s1 }
  0x25   :  { %p3319_p1 = scmp.ne.s32.totalorder %s23_s1, %s3318_s3  ;;  %p3324_p3 = scmp.lt.s32.totalorder %s3318_s3, %s3318_s3 }
  0x27   :  { %p3325_p4 = por %p3324_p3, %p3323_p2 }
  0x29   :  { %p3326_p5 = pnand %p3325_p4, %p3319_p1 }
  0x2b   :  { %3329 = shalt.err (!%p3326_p5)
}
  0x2c   :  { %s3426_s19 = smov 384   ;;  %s3427_s20 = smov 24  }
  0x2d   :  { %28 = dma.hbm_to_vmem [thread:$0]  %s3682_s0, 768, %s23_s1, [#allocation4], %s3426_s19, %s3426_s19, %s3427_s20  }
  0x2e   :  { %s3428_s23 = smov [#allocation8]  }
  0x2f   :  { %s44_s24 = sshll.u32 %s3428_s23, 4  ;;  %s45_s24 = int_to_ptr.vmem [resolvable:$true] %s44_s24 }
  0x30   :  { %s3338_s25 = scalar_lea.vmem %s45_s24, 24576  ;;  %p3343_p7 = scmp.lt.s32.totalorder %s45_s24, %s45_s24 }
  0x31   :  { %p3339_p6 = scmp.ne.s32.totalorder %s45_s24, %s3338_s25  ;;  %p3344_p8 = scmp.lt.s32.totalorder %s3338_s25, %s3338_s25 }
  0x33   :  { %p3345_p9 = por %p3344_p8, %p3343_p7 }
  0x35   :  { %p3346_p10 = pnand %p3345_p9, %p3339_p6 }
  0x37   :  { %3349 = shalt.err (!%p3346_p10)
}
  0x38   :  { %s3429_s5 = smov 256   ;;  %s3430_s26 = smov 16  }
  0x39   :  { %50 = dma.hbm_to_vmem [thread:$0]  %s3684_s2, 24576, %s45_s24, [#allocation7], %s3429_s5, %s3429_s5, %s3430_s26  }
  0x3a   :  { %s3431_s29 = smov [#allocation11]   ;;  %s3432_s0 = smov [#allocation14]  }
  0x3b   :  { %s68_s30 = sshll.u32 %s3431_s29, 4  ;;  %s93_s8 = sshll.u32 %s3432_s0, 4  ;;  %s69_s30 = int_to_ptr.vmem [resolvable:$true] %s68_s30  ;;  %s94_s8 = int_to_ptr.vmem [resolvable:$true] %s93_s8 }
  0x3c   :  { %s3358_s11 = scalar_lea.vmem %s69_s30, 8192  ;;  %p3363_p12 = scmp.lt.s32.totalorder %s69_s30, %s69_s30 }
  0x3d   :  { %p3359_p11 = scmp.ne.s32.totalorder %s69_s30, %s3358_s11  ;;  %p3364_p13 = scmp.lt.s32.totalorder %s3358_s11, %s3358_s11 }
  0x3f   :  { %p3365_p0 = por %p3364_p13, %p3363_p12 }
  0x41   :  { %p3366_p1 = pnand %p3365_p0, %p3359_p11 }
  0x43   :  { %3369 = shalt.err (!%p3366_p1)
}
  0x44   :  { %74 = dma.hbm_to_vmem [thread:$0]  %s3686_s4, 8192, %s69_s30, [#allocation10], %s3422_s9, %s3422_s9, %s3423_s10  }
  0x45   :  { %s3378_s2 = scalar_lea.vmem %s94_s8, 512  ;;  %p3383_p3 = scmp.lt.s32.totalorder %s94_s8, %s94_s8 }
  0x46   :  { %p3379_p2 = scmp.ne.s32.totalorder %s94_s8, %s3378_s2  ;;  %p3384_p4 = scmp.lt.s32.totalorder %s3378_s2, %s3378_s2 }
  0x48   :  { %p3385_p5 = por %p3384_p4, %p3383_p3 }
  0x4a   :  { %p3386_p6 = pnand %p3385_p5, %p3379_p2 }
  0x4c   :  { %3389 = shalt.err (!%p3386_p6)
}
  0x4d   :  { %96 = dma.hbm_to_vmem [thread:$0]  %s3688_s6, 512, %s94_s8, [#allocation13]  }
  0x4e   :  { %3410 = dma.done.wait [#allocation4], 768  }
  0x4f   :  { %3411 = vsyncadd [#allocation4], 4294966528 }
  0x50   :  { %3412 = dma.done.wait [#allocation7], 24704  }
  0x51   :  { %3413 = vsyncadd [#allocation7], 4294942592 }
  0x52   :  { %3414 = dma.done.wait [#allocation10], 16384  }
  0x53   :  { %3415 = vsyncadd [#allocation10], 4294950912 }
  0x54   :  { %3416 = dma.done.wait [#allocation13], 2560  }
  0x55   :  { %3417 = vsyncadd [#allocation13], 4294964736  ;;  %v3433_v0 = vmov 0.0   ;;  %v2959_v1 = vld [vmem:[#allocation8 + $0xe4] ss:$16 sps:$4 sm:$0xff]   ;;  %v233_v42 = vlaneseq  ;;  %v126_v54 = vld [vmem:[#allocation3] sm:$0xff] }
  0x56   :  { %123 = vst [vmem:[#allocation2 + $0x8] sm:$0xf] %v3433_v0  ;;  %v2961_v2 = vld [vmem:[#allocation8 + $0x2e4] ss:$16 sps:$4 sm:$0xff]   ;;  %1522 = vmatprep.subr.bf16.mxu0 %v2959_v1  ;;  %v2963_v3 = vld [vmem:[#allocation8 + $0xe0] ss:$16 sps:$4 sm:$0xff]   ;;  %v132_v58 = vunpack.c.l.bf16 %v126_v54  ;;  %v133_v59 = vunpack.c.h.bf16 %v126_v54 }
  0x57   :  { %v2964_v4 = vld [vmem:[#allocation8 + $0x2e0] ss:$16 sps:$4 sm:$0xff]   ;;  %1563 = vmatprep.subr.bf16.mxu1 %v2961_v2  ;;  %v2965_v5 = vld [vmem:[#allocation8 + $0xc4] ss:$16 sps:$4 sm:$0xff]   ;;  %1523 = vmatpush1.bf16.msra.mxu0 %v2963_v3  ;;  %v3434_v40 = vmov 1983009808  }
  0x58   :  { %1564 = vmatpush1.bf16.msra.mxu1 %v2964_v4  ;;  %v2967_v6 = vld [vmem:[#allocation8 + $0x2c4] ss:$16 sps:$4 sm:$0xff]   ;;  %v2969_v7 = vld [vmem:[#allocation8 + $0xc0] ss:$16 sps:$4 sm:$0xff]   ;;  %1524 = vmatprep.subr.bf16.mxu0 %v2965_v5  ;;  %v231_v41 = vunpack.c.l.s4 %v3434_v40  ;;  %v3509_v49 = vshrl.u32 %v233_v42, 7  ;;  %v130_v57 = vld [vmem:[#allocation3 + $0x20] sm:$0xff] }
  0x59   :  { %v2970_v8 = vld [vmem:[#allocation8 + $0x2c0] ss:$16 sps:$4 sm:$0xff]   ;;  %1565 = vmatprep.subr.bf16.mxu1 %v2967_v6  ;;  %v2971_v9 = vld [vmem:[#allocation8 + $0xa4] ss:$16 sps:$4 sm:$0xff]   ;;  %v140_v4 = vunpack.c.l.bf16 %v130_v57  ;;  %v141_v5 = vunpack.c.h.bf16 %v130_v57  ;;  %v144_v6 = vrot.slane %v132_v58, 4  ;;  %vm283_vm0 = vcmask 1041409  }
  0x5a   :  { %v2973_v10 = vld [vmem:[#allocation8 + $0x2a4] ss:$16 sps:$4 sm:$0xff]   ;;  %v2975_v11 = vld [vmem:[#allocation8 + $0xa0] ss:$16 sps:$4 sm:$0xff]   ;;  %v232_v48 = vunpack.c.0.s8 %v231_v41  ;;  %vm285_vm1 = vcmask 1043459   ;;  %vm287_vm2 = vcmask 1045509  }
  0x5b   :  { %v2976_v12 = vld [vmem:[#allocation8 + $0x2a0] ss:$16 sps:$4 sm:$0xff]   ;;  %1525 = vmatpush1.bf16.msra.mxu0 %v2969_v7  ;;  %v2977_v13 = vld [vmem:[#allocation8 + $0x84] ss:$16 sps:$4 sm:$0xff]   ;;  %v150_v7 = vrot.slane %v133_v59, 4  ;;  %vm289_vm3 = vcmask 1047559  }
  0x5c   :  { %1566 = vmatpush1.bf16.msra.mxu1 %v2970_v8  ;;  %1526 = vmatprep.subr.bf16.mxu0 %v2971_v9  ;;  %v2979_v14 = vld [vmem:[#allocation8 + $0x284] ss:$16 sps:$4 sm:$0xff]   ;;  %v2981_v15 = vld [vmem:[#allocation8 + $0x80] ss:$16 sps:$4 sm:$0xff]   ;;  %v3512_v60 = vsub.s32 %v232_v48, %v3509_v49  ;;  %vm1773_vm4 = vcmask 1041408   ;;  %vm3436_vm5 = vmmov 0  }
  0x5d   :  { %1567 = vmatprep.subr.bf16.mxu1 %v2973_v10  ;;  %v2982_v16 = vld [vmem:[#allocation8 + $0x280] ss:$16 sps:$4 sm:$0xff]   ;;  %v2983_v17 = vld [vmem:[#allocation8 + $0x64] ss:$16 sps:$4 sm:$0xff]   ;;  %s3437_s4 = smov [#allocation15]  }
  0x5e   :  { %v2985_v18 = vld [vmem:[#allocation8 + $0x264] ss:$16 sps:$4 sm:$0xff]   ;;  %v2987_v19 = vld [vmem:[#allocation8 + $0x60] ss:$16 sps:$4 sm:$0xff]   ;;  %s2545_s6 = sshll.u32 %s3437_s4, 4  ;;  %s2546_s6 = int_to_ptr.vmem [resolvable:$true] %s2545_s6 }
  0x5f   :  { %1527 = vmatpush1.bf16.msra.mxu0 %v2975_v11  ;;  %v2988_v20 = vld [vmem:[#allocation8 + $0x260] ss:$16 sps:$4 sm:$0xff]   ;;  %v2989_v21 = vld [vmem:[#allocation8 + $0x44] ss:$16 sps:$4 sm:$0xff]   ;;  %s3390_s9 = scalar_lea.vmem %s2546_s6, 32  ;;  %p3395_p8 = scmp.lt.s32.totalorder %s2546_s6, %s2546_s6 }
  0x60   :  { %1568 = vmatpush1.bf16.msra.mxu1 %v2976_v12  ;;  %1528 = vmatprep.subr.bf16.mxu0 %v2977_v13  ;;  %v2991_v22 = vld [vmem:[#allocation8 + $0x244] ss:$16 sps:$4 sm:$0xff]   ;;  %v2993_v23 = vld [vmem:[#allocation8 + $0x40] ss:$16 sps:$4 sm:$0xff]   ;;  %v145_v13 = vadd.f32 %v144_v6, %v132_v58  ;;  %p3391_p7 = scmp.ne.s32.totalorder %s2546_s6, %s3390_s9  ;;  %p3396_p9 = scmp.lt.s32.totalorder %s3390_s9, %s3390_s9 }
  0x61   :  { %1569 = vmatprep.subr.bf16.mxu1 %v2979_v14  ;;  %v2994_v24 = vld [vmem:[#allocation8 + $0x240] ss:$16 sps:$4 sm:$0xff]   ;;  %v2995_v25 = vld [vmem:[#allocation8 + $0x24] ss:$16 sps:$4 sm:$0xff]   ;;  %v151_v14 = vadd.f32 %v150_v7, %v133_v59 }
  0x62   :  { %v2997_v26 = vld [vmem:[#allocation8 + $0x224] ss:$16 sps:$4 sm:$0xff]   ;;  %v2999_v27 = vld [vmem:[#allocation8 + $0x20] ss:$16 sps:$4 sm:$0xff]   ;;  %p3397_p10 = por %p3396_p9, %p3395_p8 }
  0x63   :  { %1529 = vmatpush1.bf16.msra.mxu0 %v2981_v15  ;;  %v3000_v28 = vld [vmem:[#allocation8 + $0x220] ss:$16 sps:$4 sm:$0xff]   ;;  %v3001_v29 = vld [vmem:[#allocation8 + $0x4] ss:$16 sps:$4 sm:$0xff]   ;;  %v192_v15 = vrot.slane %v140_v4, 4 }
  0x64   :  { %1570 = vmatpush1.bf16.msra.mxu1 %v2982_v16  ;;  %1530 = vmatprep.subr.bf16.mxu0 %v2983_v17  ;;  %v3003_v30 = vld [vmem:[#allocation8 + $0x204] ss:$16 sps:$4 sm:$0xff]   ;;  %v3005_v31 = vld [vmem:[#allocation8] ss:$16 sps:$4 sm:$0xff]   ;;  %v198_v16 = vrot.slane %v141_v5, 4  ;;  %p3398_p11 = pnand %p3397_p10, %p3391_p7 }
  0x65   :  { %1571 = vmatprep.subr.bf16.mxu1 %v2985_v18  ;;  %v3006_v32 = vld [vmem:[#allocation8 + $0x200] ss:$16 sps:$4 sm:$0xff]   ;;  %v3007_v33 = vld [vmem:[#allocation8 + $0x1e4] ss:$16 sps:$4 sm:$0xff]  }
  0x66   :  { %v3009_v34 = vld [vmem:[#allocation8 + $0x3e4] ss:$16 sps:$4 sm:$0xff]   ;;  %v3011_v35 = vld [vmem:[#allocation8 + $0x1e0] ss:$16 sps:$4 sm:$0xff]  }
  0x67   :  { %1531 = vmatpush1.bf16.msra.mxu0 %v2987_v19  ;;  %v3012_v36 = vld [vmem:[#allocation8 + $0x3e0] ss:$16 sps:$4 sm:$0xff]   ;;  %v3013_v37 = vld [vmem:[#allocation8 + $0x1c4] ss:$16 sps:$4 sm:$0xff]  }
  0x68   :  { %1572 = vmatpush1.bf16.msra.mxu1 %v2988_v20  ;;  %1532 = vmatprep.subr.bf16.mxu0 %v2989_v21  ;;  %v3015_v38 = vld [vmem:[#allocation8 + $0x3c4] ss:$16 sps:$4 sm:$0xff]   ;;  %v3017_v39 = vld [vmem:[#allocation8 + $0x1c0] ss:$16 sps:$4 sm:$0xff]  }
  0x69   :  { %1573 = vmatprep.subr.bf16.mxu1 %v2991_v22  ;;  %v3018_v43 = vld [vmem:[#allocation8 + $0x3c0] ss:$16 sps:$4 sm:$0xff]   ;;  %v3019_v44 = vld [vmem:[#allocation8 + $0x1a4] ss:$16 sps:$4 sm:$0xff]  }
  0x6a   :  { %v3021_v45 = vld [vmem:[#allocation8 + $0x3a4] ss:$16 sps:$4 sm:$0xff]   ;;  %v3023_v46 = vld [vmem:[#allocation8 + $0x1a0] ss:$16 sps:$4 sm:$0xff]  }
  0x6b   :  { %1533 = vmatpush1.bf16.msra.mxu0 %v2993_v23  ;;  %v3024_v47 = vld [vmem:[#allocation8 + $0x3a0] ss:$16 sps:$4 sm:$0xff]   ;;  %v3025_v50 = vld [vmem:[#allocation8 + $0x184] ss:$16 sps:$4 sm:$0xff]   ;;  %v146_v23 = vrot.slane %v145_v13, 2 }
  0x6c   :  { %1574 = vmatpush1.bf16.msra.mxu1 %v2994_v24  ;;  %1534 = vmatprep.subr.bf16.mxu0 %v2995_v25  ;;  %v3027_v51 = vld [vmem:[#allocation8 + $0x384] ss:$16 sps:$4 sm:$0xff]   ;;  %v3029_v52 = vld [vmem:[#allocation8 + $0x180] ss:$16 sps:$4 sm:$0xff]   ;;  %v152_v24 = vrot.slane %v151_v14, 2 }
  0x6d   :  { %1575 = vmatprep.subr.bf16.mxu1 %v2997_v26  ;;  %v3030_v53 = vld [vmem:[#allocation8 + $0x380] ss:$16 sps:$4 sm:$0xff]   ;;  %v3031_v61 = vld [vmem:[#allocation8 + $0x164] ss:$16 sps:$4 sm:$0xff]   ;;  %v193_v26 = vadd.f32 %v192_v15, %v140_v4  ;;  %v3060_v15 = vld [vmem:[#allocation8 + $0xec] ss:$16 sps:$4 sm:$0xff]  }
  0x6e   :  { %v127_v55 = vld [vmem:[#allocation3 + $0x8] sm:$0xff]  ;;  %v129_v56 = vld [vmem:[#allocation3 + $0x18] sm:$0xff] }
  0x6f   :  { %1535 = vmatpush1.bf16.msra.mxu0 %v2999_v27  ;;  %v134_v62 = vunpack.c.l.bf16 %v127_v55  ;;  %v135_v63 = vunpack.c.h.bf16 %v127_v55  ;;  %v138_v1 = vunpack.c.l.bf16 %v129_v56  ;;  %v139_v2 = vunpack.c.h.bf16 %v129_v56  ;;  %v3033_v3 = vld [vmem:[#allocation8 + $0x364] ss:$16 sps:$4 sm:$0xff]   ;;  %v3035_v12 = vld [vmem:[#allocation8 + $0x160] ss:$16 sps:$4 sm:$0xff]  }
  0x70   :  { %1576 = vmatpush1.bf16.msra.mxu1 %v3000_v28  ;;  %1536 = vmatprep.subr.bf16.mxu0 %v3001_v29  ;;  %v3036_v17 = vld [vmem:[#allocation8 + $0x360] ss:$16 sps:$4 sm:$0xff]   ;;  %v3037_v18 = vld [vmem:[#allocation8 + $0x144] ss:$16 sps:$4 sm:$0xff]  }
  0x71   :  { %1577 = vmatprep.subr.bf16.mxu1 %v3003_v30  ;;  %v156_v8 = vrot.slane %v134_v62, 4  ;;  %v162_v9 = vrot.slane %v135_v63, 4  ;;  %v180_v10 = vrot.slane %v138_v1, 4  ;;  %v186_v11 = vrot.slane %v139_v2, 4  ;;  %v3039_v22 = vld [vmem:[#allocation8 + $0x344] ss:$16 sps:$4 sm:$0xff]  }
  0x72   :  { %v199_v30 = vadd.f32 %v198_v16, %v141_v5  ;;  %v3045_v42 = vld [vmem:[#allocation8 + $0x324] ss:$16 sps:$4 sm:$0xff]   ;;  %v3047_v56 = vld [vmem:[#allocation8 + $0x120] ss:$16 sps:$4 sm:$0xff]  }
  0x73   :  { %1537 = vmatpush1.bf16.msra.mxu0 %v3005_v31  ;;  %v157_v19 = vadd.f32 %v156_v8, %v134_v62  ;;  %v163_v20 = vadd.f32 %v162_v9, %v135_v63  ;;  %v181_v21 = vadd.f32 %v180_v10, %v138_v1  ;;  %v187_v25 = vadd.f32 %v186_v11, %v139_v2  ;;  %v3041_v31 = vld [vmem:[#allocation8 + $0x140] ss:$16 sps:$4 sm:$0xff]   ;;  %v3049_v63 = vld [vmem:[#allocation8 + $0x104] ss:$16 sps:$4 sm:$0xff]  }
  0x74   :  { %1578 = vmatpush1.bf16.msra.mxu1 %v3006_v32  ;;  %1538 = vmatprep.subr.bf16.mxu0 %v3007_v33  ;;  %v3042_v32 = vld [vmem:[#allocation8 + $0x340] ss:$16 sps:$4 sm:$0xff]   ;;  %v147_v33 = vadd.f32 %v146_v23, %v145_v13  ;;  %v200_v41 = vrot.slane %v199_v30, 2  ;;  %v3051_v1 = vld [vmem:[#allocation8 + $0x304] ss:$16 sps:$4 sm:$0xff]  }
  0x75   :  { %1579 = vmatprep.subr.bf16.mxu1 %v3009_v34  ;;  %v158_v27 = vrot.slane %v157_v19, 2  ;;  %v164_v28 = vrot.slane %v163_v20, 2  ;;  %v182_v29 = vrot.slane %v181_v21, 2  ;;  %v153_v34 = vadd.f32 %v152_v24, %v151_v14  ;;  %v3048_v57 = vld [vmem:[#allocation8 + $0x320] ss:$16 sps:$4 sm:$0xff]  }
  0x76   :  { %v3053_v7 = vld [vmem:[#allocation8 + $0x100] ss:$16 sps:$4 sm:$0xff]   ;;  %v3057_v14 = vld [vmem:[#allocation8 + $0x4e4] ss:$16 sps:$4 sm:$0xff]  }
  0x77   :  { %1539 = vmatpush2.bf16.msra.mxu0 %v3011_v35  ;;  %v188_v35 = vrot.slane %v187_v25, 2  ;;  %v183_v40 = vadd.f32 %v182_v29, %v181_v21  ;;  %v3054_v9 = vld [vmem:[#allocation8 + $0x300] ss:$16 sps:$4 sm:$0xff]  }
  0x78   :  { %1580 = vmatpush2.bf16.msra.mxu1 %v3012_v36  ;;  %1540 = vmatprep.subr.bf16.mxu0 %v3013_v37  ;;  %v194_v36 = vrot.slane %v193_v26, 2  ;;  %v3043_v37 = vld [vmem:[#allocation8 + $0x124] ss:$16 sps:$4 sm:$0xff]  }
  0x79   :  { %1581 = vmatprep.subr.bf16.mxu1 %v3015_v38  ;;  %v159_v38 = vadd.f32 %v158_v27, %v157_v19 }
  0x7b   :  { %1541 = vmatpush2.bf16.msra.mxu0 %v3017_v39  ;;  %v165_v39 = vadd.f32 %v164_v28, %v163_v20 }
  0x7c   :  { %1582 = vmatpush2.bf16.msra.mxu1 %v3018_v43  ;;  %1542 = vmatprep.subr.bf16.mxu0 %v3019_v44  ;;  %v148_v43 = vrot.slane %v147_v33, 1  ;;  %v154_v44 = vrot.slane %v153_v34, 1 }
  0x7d   :  { %1583 = vmatprep.subr.bf16.mxu1 %v3021_v45  ;;  %v189_v45 = vadd.f32 %v188_v35, %v187_v25  ;;  %v166_v48 = vrot.slane %v165_v39, 1 }
  0x7f   :  { %1543 = vmatpush2.bf16.msra.mxu0 %v3023_v46  ;;  %v195_v46 = vadd.f32 %v194_v36, %v193_v26  ;;  %v190_v54 = vrot.slane %v189_v45, 1  ;;  %v167_v59 = vadd.f32 %v166_v48, %v165_v39  ;;  %v3058_v36 = vld [vmem:[#allocation8 + $0xe8] ss:$16 sps:$4 sm:$0xff]   ;;  %v3069_v39 = vld [vmem:[#allocation8 + $0x4a4] ss:$16 sps:$4 sm:$0xff]  }
  0x80   :  { %1584 = vmatpush2.bf16.msra.mxu1 %v3024_v47  ;;  %1544 = vmatprep.subr.bf16.mxu0 %v3025_v50  ;;  %v160_v47 = vrot.slane %v159_v38, 1  ;;  %v184_v50 = vrot.slane %v183_v40, 1  ;;  %v3070_v48 = vld [vmem:[#allocation8 + $0xa8] ss:$16 sps:$4 sm:$0xff]  }
  0x81   :  { %1585 = vmatprep.subr.bf16.mxu1 %v3027_v51  ;;  %v201_v51 = vadd.f32 %v200_v41, %v199_v30  ;;  %v196_v55 = vrot.slane %v195_v46, 1  ;;  %v191_v2 = vadd.f32 %v190_v54, %v189_v45  ;;  %v3072_v41 = vld [vmem:[#allocation8 + $0xac] ss:$16 sps:$4 sm:$0xff]   ;;  %v131_v45 = vld [vmem:[#allocation3 + $0x28] sm:$0xff] }
  0x82   :  { %v161_v58 = vadd.f32 %v160_v47, %v159_v38  ;;  %v3061_v38 = vld [vmem:[#allocation8 + $0x4c0] ss:$16 sps:$4 sm:$0xff]  }
  0x83   :  { %1545 = vmatpush2.bf16.msra.mxu0 %v3029_v52  ;;  %v149_v52 = vadd.f32 %v148_v43, %v147_v33  ;;  %v202_v62 = vrot.slane %v201_v51, 1  ;;  %v3075_v43 = vld [vmem:[#allocation8 + $0x484] ss:$16 sps:$4 sm:$0xff]  }
  0x84   :  { %1586 = vmatpush2.bf16.msra.mxu1 %v3030_v53  ;;  %1546 = vmatprep.subr.bf16.mxu0 %v3031_v61  ;;  %v155_v53 = vadd.f32 %v154_v44, %v153_v34  ;;  %v185_v61 = vadd.f32 %v184_v50, %v183_v40  ;;  %v229_v6 = vcombine.low %v161_v58, %v167_v59  ;;  %v3063_v34 = vld [vmem:[#allocation8 + $0x4c4] ss:$16 sps:$4 sm:$0xff]   ;;  %v3064_v40 = vld [vmem:[#allocation8 + $0xc8] ss:$16 sps:$4 sm:$0xff]   ;;  %v142_v50 = vunpack.c.l.bf16 %v131_v45 }
  0x85   :  { %1587 = vmatprep.subr.bf16.mxu1 %v3033_v3  ;;  %v197_v3 = vadd.f32 %v196_v55, %v195_v46  ;;  %v203_v5 = vadd.f32 %v202_v62, %v201_v51  ;;  %v128_v44 = vld [vmem:[#allocation3 + $0x10] sm:$0xff]  ;;  %v143_v51 = vunpack.c.h.bf16 %v131_v45  ;;  %v3073_v55 = vld [vmem:[#allocation8 + $0x480] ss:$16 sps:$4 sm:$0xff]   ;;  %v3081_v58 = vld [vmem:[#allocation8 + $0x464] ss:$16 sps:$4 sm:$0xff]  }
  0x86   :  { %v228_v4 = vcombine.low %v149_v52, %v155_v53  ;;  %v253_v8 = vcombine.low %v185_v61, %v191_v2  ;;  %v243_v11 = vrot.slane %v229_v6, %v3512_v60  ;;  %v136_v46 = vunpack.c.l.bf16 %v128_v44  ;;  %v3078_v52 = vld [vmem:[#allocation8 + $0x8c] ss:$16 sps:$4 sm:$0xff]   ;;  %v3076_v62 = vld [vmem:[#allocation8 + $0x88] ss:$16 sps:$4 sm:$0xff]  }
  0x87   :  { %1547 = vmatpush2.bf16.msra.mxu0 %v3035_v12  ;;  %v254_v12 = vcombine.low %v197_v3, %v203_v5  ;;  %v137_v47 = vunpack.c.h.bf16 %v128_v44  ;;  %v3084_v2 = vld [vmem:[#allocation8 + $0x6c] ss:$16 sps:$4 sm:$0xff]   ;;  %v3079_v5 = vld [vmem:[#allocation8 + $0x460] ss:$16 sps:$4 sm:$0xff]   ;;  %v125_v44 = vld [vmem:[#allocation2 + $0x8] sm:$0xf] }
  0x88   :  { %1588 = vmatpush2.bf16.msra.mxu1 %v3036_v17  ;;  %1548 = vmatprep.subr.bf16.mxu0 %v3037_v18  ;;  %v236_v10 = vrot.slane %v228_v4, %v3512_v60  ;;  %v261_v13 = vrot.slane %v253_v8, %v3512_v60  ;;  %v168_v53 = vrot.slane %v136_v46, 4  ;;  %v3087_v8 = vld [vmem:[#allocation8 + $0x444] ss:$16 sps:$4 sm:$0xff]  }
  0x89   :  { %1589 = vmatprep.subr.bf16.mxu1 %v3039_v22  ;;  %v268_v16 = vrot.slane %v254_v12, %v3512_v60  ;;  %v174_v54 = vrot.slane %v137_v47, 4 }
  0x8a   :  { %v244_v17 = vcombine.low %v236_v10, %v243_v11  ;;  %v169_v59 = vadd.f32 %v168_v53, %v136_v46  ;;  %v3082_v11 = vld [vmem:[#allocation8 + $0x68] ss:$16 sps:$4 sm:$0xff]   ;;  %v3103_v46 = vld [vmem:[#allocation8 + $0x5e0] ss:$16 sps:$4 sm:$0xff]   ;;  %v3114_v53 = vld [vmem:[#allocation8 + $0x1cc] ss:$16 sps:$4 sm:$0xff]  }
  0x8b   :  { %1549 = vmatpush2.bf16.msra.mxu0 %v3041_v31  ;;  %v269_v18 = vcombine.low %v261_v13, %v268_v16  ;;  %v175_v61 = vadd.f32 %v174_v54, %v137_v47  ;;  %v3109_v54 = vld [vmem:[#allocation8 + $0x5c0] ss:$16 sps:$4 sm:$0xff]  }
  0x8c   :  { %1590 = vmatpush2.bf16.msra.mxu1 %v3042_v32  ;;  %1550 = vmatprep.subr.bf16.mxu0 %v3043_v37  ;;  %v3055_v32 = vld [vmem:[#allocation8 + $0x4e0] ss:$16 sps:$4 sm:$0xff]   ;;  %v3066_v37 = vld [vmem:[#allocation8 + $0xcc] ss:$16 sps:$4 sm:$0xff]   ;;  %v170_v3 = vrot.slane %v169_v59, 2 }
  0x8d   :  { %1591 = vmatprep.subr.bf16.mxu1 %v3045_v42  ;;  %v282_v19 = vrot.slane %v269_v18, 7  ;;  %v3067_v42 = vld [vmem:[#allocation8 + $0x4a0] ss:$16 sps:$4 sm:$0xff]   ;;  %v176_v4 = vrot.slane %v175_v61, 2 }
  0x8f   :  { %1551 = vmatpush2.bf16.msra.mxu0 %v3047_v56  ;;  %v284_v20 = vsel %vm283_vm0, %v282_v19, %v244_v17  ;;  %v204_v56 = vrot.slane %v142_v50, 4  ;;  %v177_v10 = vadd.f32 %v176_v4, %v175_v61  ;;  %v3085_v17 = vld [vmem:[#allocation8 + $0x440] ss:$16 sps:$4 sm:$0xff]   ;;  %v3118_v61 = vld [vmem:[#allocation8 + $0x1a8] ss:$16 sps:$4 sm:$0xff]  }
  0x90   :  { %1592 = vmatpush2.bf16.msra.mxu1 %v3048_v57  ;;  %1552 = vmatprep.subr.bf16.mxu0 %v3049_v63  ;;  %v286_v21 = vsel %vm285_vm1, %v282_v19, %v284_v20  ;;  %v210_v57 = vrot.slane %v143_v51, 4  ;;  %v3093_v20 = vld [vmem:[#allocation8 + $0x424] ss:$16 sps:$4 sm:$0xff]   ;;  %v3124_v4 = vld [vmem:[#allocation8 + $0x188] ss:$16 sps:$4 sm:$0xff]  }
  0x91   :  { %1593 = vmatprep.subr.bf16.mxu1 %v3051_v1  ;;  %v288_v22 = vsel %vm287_vm2, %v282_v19, %v286_v21  ;;  %v205_v63 = vadd.f32 %v204_v56, %v142_v50  ;;  %v178_v16 = vrot.slane %v177_v10, 1  ;;  %v3112_v56 = vld [vmem:[#allocation8 + $0x1c8] ss:$16 sps:$4 sm:$0xff]  }
  0x92   :  { %v290_v23 = vsel %vm289_vm3, %v282_v19, %v288_v22  ;;  %v211_v1 = vadd.f32 %v210_v57, %v143_v51  ;;  %v3106_v51 = vld [vmem:[#allocation8 + $0x1e8] ss:$16 sps:$4 sm:$0xff]   ;;  %v3120_v57 = vld [vmem:[#allocation8 + $0x1ac] ss:$16 sps:$4 sm:$0xff]  }
  0x93   :  { %1553 = vmatpush2.bf16.msra.mxu0 %v3053_v7  ;;  %v313_v24 = vmul.f32 0.125, %v290_v23  ;;  %v206_v6 = vrot.slane %v205_v63, 2  ;;  %v179_v22 = vadd.f32 %v178_v16, %v177_v10  ;;  %v3088_v23 = vld [vmem:[#allocation8 + $0x48] ss:$16 sps:$4 sm:$0xff]   ;;  %v3144_v16 = vld [vmem:[#allocation8 + $0x12c] ss:$16 sps:$4 sm:$0xff]  }
  0x94   :  { %1594 = vmatpush2.bf16.msra.mxu1 %v3054_v9  ;;  %1604 = vmatprep.subr.bf16.mxu0 %v3057_v14  ;;  %v212_v7 = vrot.slane %v211_v1, 2  ;;  %v171_v9 = vadd.f32 %v170_v3, %v169_v59  ;;  %v3090_v14 = vld [vmem:[#allocation8 + $0x4c] ss:$16 sps:$4 sm:$0xff]   ;;  %v3123_v59 = vld [vmem:[#allocation8 + $0x584] ss:$16 sps:$4 sm:$0xff]  }
  0x95   :  { %1645 = vmatprep.subr.bf16.mxu1 %v3060_v15  ;;  %v324_v25 = vrot.slane %v313_v24, %v3512_v60  ;;  %v317_v26 = vcombine.high %v313_v24, %v313_v24  ;;  %v207_v12 = vadd.f32 %v206_v6, %v205_v63  ;;  %v3129_v3 = vld [vmem:[#allocation8 + $0x564] ss:$16 sps:$4 sm:$0xff]   ;;  %v3132_v6 = vld [vmem:[#allocation8 + $0x16c] ss:$16 sps:$4 sm:$0xff]   ;;  %v3130_v10 = vld [vmem:[#allocation8 + $0x168] ss:$16 sps:$4 sm:$0xff]  }
  0x96   :  { %v213_v13 = vadd.f32 %v212_v7, %v211_v1  ;;  %v172_v15 = vrot.slane %v171_v9, 1  ;;  %v3121_v1 = vld [vmem:[#allocation8 + $0x580] ss:$16 sps:$4 sm:$0xff]  }
  0x97   :  { %v332_v27 = vcombine.high %v324_v25, %v324_v25  ;;  %v331_v28 = vrot.slane %v317_v26, %v3512_v60  ;;  %v3524_v29 = vpack.c.bf16 %v324_v25, %v324_v25  ;;  %v208_v18 = vrot.slane %v207_v12, 1  ;;  %v3096_v26 = vld [vmem:[#allocation8 + $0x2c] ss:$16 sps:$4 sm:$0xff]   ;;  %v3127_v7 = vld [vmem:[#allocation8 + $0x560] ss:$16 sps:$4 sm:$0xff]  }
  0x98   :  { %v214_v19 = vrot.slane %v213_v13, 1  ;;  %v173_v21 = vadd.f32 %v172_v15, %v171_v9  ;;  %v3135_v9 = vld [vmem:[#allocation8 + $0x544] ss:$16 sps:$4 sm:$0xff]   ;;  %v3136_v15 = vld [vmem:[#allocation8 + $0x148] ss:$16 sps:$4 sm:$0xff]  }
  0x99   :  { %v349_v30 = vpack.c.bf16 %v332_v27, %v332_v27  ;;  %v333_v31 = vcombine.high %v331_v28, %v331_v28  ;;  %v3526_v33 = vpack.c.bf16 %v331_v28, %v331_v28  ;;  %v209_v24 = vadd.f32 %v208_v18, %v207_v12  ;;  %v3091_v28 = vld [vmem:[#allocation8 + $0x420] ss:$16 sps:$4 sm:$0xff]   ;;  %v3138_v12 = vld [vmem:[#allocation8 + $0x14c] ss:$16 sps:$4 sm:$0xff]   ;;  %v3147_v18 = vld [vmem:[#allocation8 + $0x504] ss:$16 sps:$4 sm:$0xff]  }
  0x9a   :  { %v215_v25 = vadd.f32 %v214_v19, %v213_v13  ;;  %v245_v27 = vcombine.low %v173_v21, %v179_v22  ;;  %v3133_v13 = vld [vmem:[#allocation8 + $0x540] ss:$16 sps:$4 sm:$0xff]   ;;  %v3142_v19 = vld [vmem:[#allocation8 + $0x128] ss:$16 sps:$4 sm:$0xff]   ;;  %v3153_v22 = vld [vmem:[#allocation8 + $0x2ec] ss:$16 sps:$4 sm:$0xff]  }
  0x9b   :  { %1554 = vmatprep.mubr.bf16.mxu0 %v349_v30  ;;  %v3528_v35 = vpack.c.bf16 %v333_v31, %v333_v31  ;;  %v3099_v31 = vld [vmem:[#allocation8 + $0x404] ss:$16 sps:$4 sm:$0xff]   ;;  %v3145_v21 = vld [vmem:[#allocation8 + $0x500] ss:$16 sps:$4 sm:$0xff]  }
  0x9c   :  { %1555 = vmatmul.mubr.bf16.vlgmr.msra.gmra.mxu0 %v3524_v29 }
  0x9d   :  { %1595 = vmatprep.mubr.bf16.mxu1 %v3528_v35  ;;  %1605 = vmatpush1.bf16.msra.mxu0 %v3055_v32  ;;  %v3094_v32 = vld [vmem:[#allocation8 + $0x28] ss:$16 sps:$4 sm:$0xff]  }
  0x9e   :  { %1596 = vmatmul.mubr.bf16.vlgmr.msra.gmra.mxu1 %v3526_v33  ;;  %1606 = vmatprep.subr.bf16.mxu0 %v3063_v34  ;;  %v252_v34 = vrot.slane %v245_v27, %v3512_v60  ;;  %v3159_v27 = vld [vmem:[#allocation8 + $0x2cc] ss:$16 sps:$4 sm:$0xff]  }
  0x9f   :  { %1646 = vmatpush1.bf16.msra.mxu1 %v3058_v36  ;;  %1677 = vmatprep.mubr.bf16.mxu1 %v349_v30  ;;  %v270_v30 = vcombine.low %v209_v24, %v215_v25  ;;  %v3156_v25 = vld [vmem:[#allocation8 + $0x4ec] ss:$16 sps:$4 sm:$0xff]  }
  0xa0   :  { %1647 = vmatprep.subr.bf16.mxu1 %v3066_v37  ;;  %v3102_v37 = vld [vmem:[#allocation8 + $0xc] ss:$16 sps:$4 sm:$0xff]  }
  0xa1   :  { %1607 = vmatpush1.bf16.msra.mxu0 %v3061_v38  ;;  %v277_v36 = vrot.slane %v270_v30, %v3512_v60  ;;  %v3097_v38 = vld [vmem:[#allocation8 + $0x400] ss:$16 sps:$4 sm:$0xff]   ;;  %v3162_v30 = vld [vmem:[#allocation8 + $0x4cc] ss:$16 sps:$4 sm:$0xff]  }
  0xa2   :  { %1608 = vmatprep.subr.bf16.mxu0 %v3069_v39 }
  0xa3   :  { %1648 = vmatpush1.bf16.msra.mxu1 %v3064_v40  ;;  %v293_v39 = vrot.slane %v277_v36, 7  ;;  %v3105_v40 = vld [vmem:[#allocation8 + $0x5e4] ss:$16 sps:$4 sm:$0xff]   ;;  %v3168_v36 = vld [vmem:[#allocation8 + $0x4ac] ss:$16 sps:$4 sm:$0xff]  }
  0xa4   :  { %1649 = vmatprep.subr.bf16.mxu1 %v3072_v41  ;;  %v3100_v41 = vld [vmem:[#allocation8 + $0x8] ss:$16 sps:$4 sm:$0xff]  }
  0xa5   :  { %1609 = vmatpush1.bf16.msra.mxu0 %v3067_v42  ;;  %v294_v42 = vsel %vm283_vm0, %v293_v39, %v252_v34  ;;  %v3160_v34 = vld [vmem:[#allocation8 + $0x4c8] ss:$16 sps:$4 sm:$0xff]  }
  0xa6   :  { %1610 = vmatprep.subr.bf16.mxu0 %v3075_v43  ;;  %v3108_v43 = vld [vmem:[#allocation8 + $0x1ec] ss:$16 sps:$4 sm:$0xff]   ;;  %v295_v45 = vsel %vm285_vm1, %v293_v39, %v294_v42 }
  0xa7   :  { %1650 = vmatpush1.bf16.msra.mxu1 %v3070_v48  ;;  %v296_v47 = vsel %vm287_vm2, %v293_v39, %v295_v45  ;;  %v3111_v48 = vld [vmem:[#allocation8 + $0x5c4] ss:$16 sps:$4 sm:$0xff]   ;;  %v3180_v42 = vld [vmem:[#allocation8 + $0x46c] ss:$16 sps:$4 sm:$0xff]   ;;  %v3178_v45 = vld [vmem:[#allocation8 + $0x468] ss:$16 sps:$4 sm:$0xff]  }
  0xa8   :  { %1651 = vmatprep.subr.bf16.mxu1 %v3078_v52  ;;  %v297_v50 = vsel %vm289_vm3, %v293_v39, %v296_v47  ;;  %v3166_v39 = vld [vmem:[#allocation8 + $0x4a8] ss:$16 sps:$4 sm:$0xff]  }
  0xa9   :  { %1611 = vmatpush1.bf16.msra.mxu0 %v3073_v55  ;;  %v301_v52 = vadd.f32 %v297_v50, %v125_v44  ;;  %v3117_v55 = vld [vmem:[#allocation8 + $0x5a4] ss:$16 sps:$4 sm:$0xff]   ;;  %v3183_v44 = vld [vmem:[#allocation8 + $0x24c] ss:$16 sps:$4 sm:$0xff]   ;;  %v3181_v47 = vld [vmem:[#allocation8 + $0x248] ss:$16 sps:$4 sm:$0xff]  }
  0xaa   :  { %1612 = vmatprep.subr.bf16.mxu0 %v3081_v58  ;;  %v3115_v58 = vld [vmem:[#allocation8 + $0x5a0] ss:$16 sps:$4 sm:$0xff]   ;;  %v3184_v50 = vld [vmem:[#allocation8 + $0x448] ss:$16 sps:$4 sm:$0xff]  }
  0xab   :  { %1652 = vmatpush1.bf16.msra.mxu1 %v3076_v62  ;;  %303 = vst [vmem:[#allocation2 + $0x8] sm:$0xf] %v301_v52  ;;  %v3126_v62 = vld [vmem:[#allocation8 + $0x18c] ss:$16 sps:$4 sm:$0xff]   ;;  %v3187_v52 = vld [vmem:[#allocation8 + $0x228] ss:$16 sps:$4 sm:$0xff]  }
  0xac   :  { %1653 = vmatprep.subr.bf16.mxu1 %v3084_v2 }
  0xad   :  { %1613 = vmatpush1.bf16.msra.mxu0 %v3079_v5 }
  0xae   :  { %1614 = vmatprep.subr.bf16.mxu0 %v3087_v8 }
  0xaf   :  { %1654 = vmatpush1.bf16.msra.mxu1 %v3082_v11 }
  0xb0   :  { %1655 = vmatprep.subr.bf16.mxu1 %v3090_v14  ;;  %v3141_v14 = vld [vmem:[#allocation8 + $0x524] ss:$16 sps:$4 sm:$0xff]  }
  0xb1   :  { %1615 = vmatpush1.bf16.msra.mxu0 %v3085_v17  ;;  %v3139_v17 = vld [vmem:[#allocation8 + $0x520] ss:$16 sps:$4 sm:$0xff]  }
  0xb2   :  { %1616 = vmatprep.subr.bf16.mxu0 %v3093_v20  ;;  %v312_v63 = vld [vmem:[#allocation2 + $0x8] sm:$0xf]  ;;  %v3150_v20 = vld [vmem:[#allocation8 + $0x10c] ss:$16 sps:$4 sm:$0xff]  }
  0xb3   :  { %1656 = vmatpush1.bf16.msra.mxu1 %v3088_v23  ;;  %v314_v2 = vmul.f32 0.125, %v312_v63  ;;  %v3148_v23 = vld [vmem:[#allocation8 + $0x108] ss:$16 sps:$4 sm:$0xff]  }
  0xb4   :  { %1657 = vmatprep.subr.bf16.mxu1 %v3096_v26  ;;  %v3151_v26 = vld [vmem:[#allocation8 + $0x2e8] ss:$16 sps:$4 sm:$0xff]  }
  0xb5   :  { %1617 = vmatpush1.bf16.msra.mxu0 %v3091_v28  ;;  %v340_v5 = vrot.slane %v314_v2, %v3512_v60  ;;  %v3154_v28 = vld [vmem:[#allocation8 + $0x4e8] ss:$16 sps:$4 sm:$0xff]  }
  0xb6   :  { %1618 = vmatprep.subr.bf16.mxu0 %v3099_v31  ;;  %v3157_v31 = vld [vmem:[#allocation8 + $0x2c8] ss:$16 sps:$4 sm:$0xff]  }
  0xb7   :  { %1658 = vmatpush1.bf16.msra.mxu1 %v3094_v32  ;;  %v341_v8 = vcombine.high %v340_v5, %v340_v5  ;;  %v3540_v24 = vpack.c.bf16 %v340_v5, %v340_v5  ;;  %v3165_v32 = vld [vmem:[#allocation8 + $0x2ac] ss:$16 sps:$4 sm:$0xff]   ;;  %v3202_v63 = vld [vmem:[#allocation8 + $0x5e8] ss:$16 sps:$4 sm:$0xff]  }
  0xb8   :  { %1659 = vmatprep.subr.bf16.mxu1 %v3102_v37  ;;  %v3163_v37 = vld [vmem:[#allocation8 + $0x2a8] ss:$16 sps:$4 sm:$0xff]   ;;  %v3216_v5 = vld [vmem:[#allocation8 + $0x5ac] ss:$16 sps:$4 sm:$0xff]  }
  0xb9   :  { %1619 = vmatpush1.bf16.msra.mxu0 %v3097_v38  ;;  %v353_v11 = vpack.c.bf16 %v341_v8, %v341_v8  ;;  %v3171_v38 = vld [vmem:[#allocation8 + $0x28c] ss:$16 sps:$4 sm:$0xff]   ;;  %v3205_v2 = vld [vmem:[#allocation8 + $0x3c8] ss:$16 sps:$4 sm:$0xff]  }
  0xba   :  { %1620 = vmatprep.subr.bf16.mxu0 %v3105_v40  ;;  %v3174_v40 = vld [vmem:[#allocation8 + $0x48c] ss:$16 sps:$4 sm:$0xff]   ;;  %v3214_v8 = vld [vmem:[#allocation8 + $0x5a8] ss:$16 sps:$4 sm:$0xff]  }
  0xbb   :  { %1660 = vmatpush1.bf16.msra.mxu1 %v3100_v41  ;;  %1636 = vmatprep.mubr.bf16.mxu0 %v353_v11  ;;  %v3169_v41 = vld [vmem:[#allocation8 + $0x288] ss:$16 sps:$4 sm:$0xff]  }
  0xbc   :  { %1661 = vmatprep.subr.bf16.mxu1 %v3108_v43  ;;  %v3175_v43 = vld [vmem:[#allocation8 + $0x268] ss:$16 sps:$4 sm:$0xff]  }
  0xbd   :  { %1621 = vmatpush2.bf16.msra.mxu0 %v3103_v46  ;;  %v3186_v46 = vld [vmem:[#allocation8 + $0x44c] ss:$16 sps:$4 sm:$0xff]  }
  0xbe   :  { %1622 = vmatprep.subr.bf16.mxu0 %v3111_v48  ;;  %v3189_v48 = vld [vmem:[#allocation8 + $0x22c] ss:$16 sps:$4 sm:$0xff]  }
  0xbf   :  { %1662 = vmatpush2.bf16.msra.mxu1 %v3106_v51  ;;  %v3192_v51 = vld [vmem:[#allocation8 + $0x42c] ss:$16 sps:$4 sm:$0xff]  }
  0xc0   :  { %1663 = vmatprep.subr.bf16.mxu1 %v3114_v53  ;;  %v3195_v53 = vld [vmem:[#allocation8 + $0x20c] ss:$16 sps:$4 sm:$0xff]  }
  0xc1   :  { %1623 = vmatpush2.bf16.msra.mxu0 %v3109_v54  ;;  %v3190_v54 = vld [vmem:[#allocation8 + $0x428] ss:$16 sps:$4 sm:$0xff]  }
  0xc2   :  { %1624 = vmatprep.subr.bf16.mxu0 %v3117_v55  ;;  %v3198_v55 = vld [vmem:[#allocation8 + $0x40c] ss:$16 sps:$4 sm:$0xff]  }
  0xc3   :  { %1664 = vmatpush2.bf16.msra.mxu1 %v3112_v56  ;;  %v3193_v56 = vld [vmem:[#allocation8 + $0x208] ss:$16 sps:$4 sm:$0xff]  }
  0xc4   :  { %1665 = vmatprep.subr.bf16.mxu1 %v3120_v57  ;;  %v3201_v57 = vld [vmem:[#allocation8 + $0x3ec] ss:$16 sps:$4 sm:$0xff]  }
  0xc5   :  { %1625 = vmatpush2.bf16.msra.mxu0 %v3115_v58  ;;  %v3196_v58 = vld [vmem:[#allocation8 + $0x408] ss:$16 sps:$4 sm:$0xff]  }
  0xc6   :  { %1626 = vmatprep.subr.bf16.mxu0 %v3123_v59  ;;  %v3204_v59 = vld [vmem:[#allocation8 + $0x5ec] ss:$16 sps:$4 sm:$0xff]  }
  0xc7   :  { %1666 = vmatpush2.bf16.msra.mxu1 %v3118_v61  ;;  %v3199_v61 = vld [vmem:[#allocation8 + $0x3e8] ss:$16 sps:$4 sm:$0xff]  }
  0xc8   :  { %1667 = vmatprep.subr.bf16.mxu1 %v3126_v62  ;;  %v3207_v62 = vld [vmem:[#allocation8 + $0x3cc] ss:$16 sps:$4 sm:$0xff]  }
  0xc9   :  { %1627 = vmatpush2.bf16.msra.mxu0 %v3121_v1  ;;  %v3210_v1 = vld [vmem:[#allocation8 + $0x5cc] ss:$16 sps:$4 sm:$0xff]  }
  0xca   :  { %1628 = vmatprep.subr.bf16.mxu0 %v3129_v3  ;;  %v3213_v3 = vld [vmem:[#allocation8 + $0x3ac] ss:$16 sps:$4 sm:$0xff]  }
  0xcb   :  { %1668 = vmatpush2.bf16.msra.mxu1 %v3124_v4  ;;  %v3208_v4 = vld [vmem:[#allocation8 + $0x5c8] ss:$16 sps:$4 sm:$0xff]  }
  0xcc   :  { %1669 = vmatprep.subr.bf16.mxu1 %v3132_v6  ;;  %v3211_v6 = vld [vmem:[#allocation8 + $0x3a8] ss:$16 sps:$4 sm:$0xff]  }
  0xcd   :  { %1629 = vmatpush2.bf16.msra.mxu0 %v3127_v7  ;;  %v3219_v7 = vld [vmem:[#allocation8 + $0x38c] ss:$16 sps:$4 sm:$0xff]  }
  0xce   :  { %1630 = vmatprep.subr.bf16.mxu0 %v3135_v9  ;;  %v3222_v9 = vld [vmem:[#allocation8 + $0x58c] ss:$16 sps:$4 sm:$0xff]  }
  0xcf   :  { %1670 = vmatpush2.bf16.msra.mxu1 %v3130_v10  ;;  %v3217_v10 = vld [vmem:[#allocation8 + $0x388] ss:$16 sps:$4 sm:$0xff]  }
  0xd0   :  { %1671 = vmatprep.subr.bf16.mxu1 %v3138_v12  ;;  %v3220_v12 = vld [vmem:[#allocation8 + $0x588] ss:$16 sps:$4 sm:$0xff]  }
  0xd1   :  { %1631 = vmatpush2.bf16.msra.mxu0 %v3133_v13  ;;  %v3228_v13 = vld [vmem:[#allocation8 + $0x56c] ss:$16 sps:$4 sm:$0xff]  }
  0xd2   :  { %1632 = vmatprep.subr.bf16.mxu0 %v3141_v14  ;;  %v3223_v14 = vld [vmem:[#allocation8 + $0x368] ss:$16 sps:$4 sm:$0xff]  }
  0xd3   :  { %1672 = vmatpush2.bf16.msra.mxu1 %v3136_v15  ;;  %v3231_v15 = vld [vmem:[#allocation8 + $0x34c] ss:$16 sps:$4 sm:$0xff]  }
  0xd4   :  { %1673 = vmatprep.subr.bf16.mxu1 %v3144_v16  ;;  %v3226_v16 = vld [vmem:[#allocation8 + $0x568] ss:$16 sps:$4 sm:$0xff]  }
  0xd5   :  { %1633 = vmatpush2.bf16.msra.mxu0 %v3139_v17  ;;  %v3234_v17 = vld [vmem:[#allocation8 + $0x54c] ss:$16 sps:$4 sm:$0xff]  }
  0xd6   :  { %1634 = vmatprep.subr.bf16.mxu0 %v3147_v18  ;;  %v3229_v18 = vld [vmem:[#allocation8 + $0x348] ss:$16 sps:$4 sm:$0xff]  }
  0xd7   :  { %1674 = vmatpush2.bf16.msra.mxu1 %v3142_v19  ;;  %v3237_v19 = vld [vmem:[#allocation8 + $0x32c] ss:$16 sps:$4 sm:$0xff]  }
  0xd8   :  { %1675 = vmatprep.subr.bf16.mxu1 %v3150_v20  ;;  %v3232_v20 = vld [vmem:[#allocation8 + $0x548] ss:$16 sps:$4 sm:$0xff]  }
  0xd9   :  { %1635 = vmatpush2.bf16.msra.mxu0 %v3145_v21  ;;  %v3240_v21 = vld [vmem:[#allocation8 + $0x52c] ss:$16 sps:$4 sm:$0xff]  }
  0xda   :  { %1686 = vmatprep.subr.bf16.mxu0 %v3153_v22  ;;  %v3235_v22 = vld [vmem:[#allocation8 + $0x328] ss:$16 sps:$4 sm:$0xff]  }
  0xdb   :  { %1676 = vmatpush2.bf16.msra.mxu1 %v3148_v23  ;;  %v3243_v23 = vld [vmem:[#allocation8 + $0x30c] ss:$16 sps:$4 sm:$0xff]  }
  0xdc   :  { %1637 = vmatmul.mubr.bf16.vlgmr.msra.gmra.mxu0 %v3540_v24  ;;  %1727 = vmatprep.subr.bf16.mxu1 %v3156_v25  ;;  %v3238_v25 = vld [vmem:[#allocation8 + $0x528] ss:$16 sps:$4 sm:$0xff]  }
  0xdd   :  { %1687 = vmatpush1.bf16.msra.mxu0 %v3151_v26  ;;  %1718 = vmatprep.mubr.bf16.mxu0 %v3528_v35  ;;  %v3177_v35 = vld [vmem:[#allocation8 + $0x26c] ss:$16 sps:$4 sm:$0xff]  }
  0xde   :  { %1678 = vmatmul.mubr.bf16.vlgmr.msra.gmra.mxu1 %v3524_v29  ;;  %1688 = vmatprep.subr.bf16.mxu0 %v3159_v27  ;;  %v3172_v29 = vld [vmem:[#allocation8 + $0x488] ss:$16 sps:$4 sm:$0xff]   ;;  %v3246_v26 = vld [vmem:[#allocation8 + $0x50c] ss:$16 sps:$4 sm:$0xff]  }
  0xdf   :  { %1728 = vmatpush1.bf16.msra.mxu1 %v3154_v28  ;;  %1759 = vmatprep.mubr.bf16.mxu1 %v353_v11  ;;  %v3225_v11 = vld [vmem:[#allocation8 + $0x36c] ss:$16 sps:$4 sm:$0xff]   ;;  %v3241_v27 = vld [vmem:[#allocation8 + $0x308] ss:$16 sps:$4 sm:$0xff]  }
  0xe0   :  { %1729 = vmatprep.subr.bf16.mxu1 %v3162_v30  ;;  %v3244_v28 = vld [vmem:[#allocation8 + $0x508] ss:$16 sps:$4 sm:$0xff]   ;;  %v548_v30 = vsub.s32 0, %v3509_v49 }
  0xe1   :  { %1689 = vmatpush1.bf16.msra.mxu0 %v3157_v31  ;;  %v3548_v31 = vld [vmem:[#allocation14] sm:$0xff] }
  0xe2   :  { %1690 = vmatprep.subr.bf16.mxu0 %v3165_v32  ;;  %v3550_v32 = vld [vmem:[#allocation14 + $0x8] sm:$0xff] }
  0xe3   :  { %1730 = vmatpush1.bf16.msra.mxu1 %v3160_v34  ;;  %v549_v34 = vrot.slane %v3548_v31, %v548_v30 }
  0xe4   :  { %1731 = vmatprep.subr.bf16.mxu1 %v3168_v36  ;;  %v553_v36 = vrot.slane %v3550_v32, %v548_v30 }
  0xe5   :  { %1691 = vmatpush1.bf16.msra.mxu0 %v3163_v37 }
  0xe6   :  { %1692 = vmatprep.subr.bf16.mxu0 %v3171_v38 }
  0xe7   :  { %1732 = vmatpush1.bf16.msra.mxu1 %v3166_v39 }
  0xe8   :  { %1733 = vmatprep.subr.bf16.mxu1 %v3174_v40 }
  0xe9   :  { %1693 = vmatpush1.bf16.msra.mxu0 %v3169_v41 }
  0xea   :  { %1694 = vmatprep.subr.bf16.mxu0 %v3177_v35 }
  0xeb   :  { %1734 = vmatpush1.bf16.msra.mxu1 %v3172_v29 }
  0xec   :  { %1735 = vmatprep.subr.bf16.mxu1 %v3180_v42 }
  0xed   :  { %1695 = vmatpush1.bf16.msra.mxu0 %v3175_v43 }
  0xee   :  { %1696 = vmatprep.subr.bf16.mxu0 %v3183_v44 }
  0xef   :  { %1736 = vmatpush1.bf16.msra.mxu1 %v3178_v45 }
  0xf0   :  { %1737 = vmatprep.subr.bf16.mxu1 %v3186_v46 }
  0xf1   :  { %1697 = vmatpush1.bf16.msra.mxu0 %v3181_v47 }
  0xf2   :  { %1698 = vmatprep.subr.bf16.mxu0 %v3189_v48 }
  0xf3   :  { %1738 = vmatpush1.bf16.msra.mxu1 %v3184_v50 }
  0xf4   :  { %1739 = vmatprep.subr.bf16.mxu1 %v3192_v51 }
  0xf5   :  { %1699 = vmatpush1.bf16.msra.mxu0 %v3187_v52 }
  0xf6   :  { %1700 = vmatprep.subr.bf16.mxu0 %v3195_v53 }
  0xf7   :  { %1740 = vmatpush1.bf16.msra.mxu1 %v3190_v54 }
  0xf8   :  { %1741 = vmatprep.subr.bf16.mxu1 %v3198_v55  ;;  %v1772_v55 = vld [vmem:[#allocation6] sm:$0xff] }
  0xf9   :  { %1701 = vmatpush1.bf16.msra.mxu0 %v3193_v56  ;;  %v3556_v56 = vld [vmem:[#allocation14 + $0x10] sm:$0xff] }
  0xfa   :  { %1702 = vmatprep.subr.bf16.mxu0 %v3201_v57  ;;  %v1791_v57 = vrot.slane %v1772_v55, %v3512_v60 }
  0xfb   :  { %1742 = vmatpush1.bf16.msra.mxu1 %v3196_v58  ;;  %v3559_v58 = vld [vmem:[#allocation14 + $0x18] sm:$0xff] }
  0xfc   :  { %1743 = vmatprep.subr.bf16.mxu1 %v3204_v59  ;;  %v557_v59 = vrot.slane %v3556_v56, %v548_v30 }
  0xfd   :  { %1703 = vmatpush2.bf16.msra.mxu0 %v3199_v61 }
  0xfe   :  { %1704 = vmatprep.subr.bf16.mxu0 %v3207_v62  ;;  %v1784_v62 = vcombine.high %v1772_v55, %v1772_v55 }
  0xff   :  { %1744 = vmatpush2.bf16.msra.mxu1 %v3202_v63  ;;  %v561_v63 = vrot.slane %v3559_v58, %v548_v30 }
 0x100   :  { %1745 = vmatprep.subr.bf16.mxu1 %v3210_v1  ;;  %v1799_v1 = vcombine.high %v1791_v57, %v1791_v57 }
 0x101   :  { %1705 = vmatpush2.bf16.msra.mxu0 %v3205_v2 }
 0x102   :  { %1706 = vmatprep.subr.bf16.mxu0 %v3213_v3 }
 0x103   :  { %1746 = vmatpush2.bf16.msra.mxu1 %v3208_v4 }
 0x104   :  { %1747 = vmatprep.subr.bf16.mxu1 %v3216_v5  ;;  %v1798_v5 = vrot.slane %v1784_v62, %v3512_v60 }
 0x105   :  { %1707 = vmatpush2.bf16.msra.mxu0 %v3211_v6  ;;  %v1805_v6 = vsel %vm1773_vm4, %v1791_v57, 0.0 }
 0x106   :  { %1708 = vmatprep.subr.bf16.mxu0 %v3219_v7 }
 0x107   :  { %1748 = vmatpush2.bf16.msra.mxu1 %v3214_v8 }
 0x108   :  { %1749 = vmatprep.subr.bf16.mxu1 %v3222_v9 }
 0x109   :  { %1709 = vmatpush2.bf16.msra.mxu0 %v3217_v10  ;;  %v1806_v10 = vsel %vm1773_vm4, %v1799_v1, 0.0 }
 0x10a   :  { %1710 = vmatprep.subr.bf16.mxu0 %v3225_v11 }
 0x10b   :  { %1750 = vmatpush2.bf16.msra.mxu1 %v3220_v12 }
 0x10c   :  { %1751 = vmatprep.subr.bf16.mxu1 %v3228_v13 }
 0x10d   :  { %1711 = vmatpush2.bf16.msra.mxu0 %v3223_v14 }
 0x10e   :  { %1712 = vmatprep.subr.bf16.mxu0 %v3231_v15 }
 0x10f   :  { %1752 = vmatpush2.bf16.msra.mxu1 %v3226_v16 }
 0x110   :  { %1753 = vmatprep.subr.bf16.mxu1 %v3234_v17 }
 0x111   :  { %1713 = vmatpush2.bf16.msra.mxu0 %v3229_v18  ;;  %v1800_v18 = vcombine.high %v1798_v5, %v1798_v5 }
 0x112   :  { %1714 = vmatprep.subr.bf16.mxu0 %v3237_v19  ;;  %v1807_v19 = vadd.f32 %v1806_v10, %v1805_v6 }
 0x113   :  { %1754 = vmatpush2.bf16.msra.mxu1 %v3232_v20 }
 0x114   :  { %1755 = vmatprep.subr.bf16.mxu1 %v3240_v21 }
 0x115   :  { %1715 = vmatpush2.bf16.msra.mxu0 %v3235_v22 }
 0x116   :  { %1716 = vmatprep.subr.bf16.mxu0 %v3243_v23  ;;  %v1808_v23 = vsel %vm1773_vm4, %v1798_v5, 0.0 }
 0x117   :  { %1756 = vmatpush2.bf16.msra.mxu1 %v3238_v25 }
 0x118   :  { %1757 = vmatprep.subr.bf16.mxu1 %v3246_v26 }
 0x119   :  { %1717 = vmatpush2.bf16.msra.mxu0 %v3241_v27 }
 0x11b   :  { %1758 = vmatpush2.bf16.msra.mxu1 %v3244_v28 }
 0x11c   :  { %1719 = vmatmul.mubr.bf16.vlgmr.msra.gmra.mxu0 %v3526_v33 }
 0x11e   :  { %1760 = vmatmul.mubr.bf16.vlgmr.msra.gmra.mxu1 %v3540_v24 }
 0x15c   :  { %v1556_v37 = vpop.f32.mrf.mxu0 }
 0x15d   :  { %v1557_v38 = vadd.f32 %v1556_v37, %v549_v34  ;;  %v1809_v37 = vadd.f32 %v1808_v23, %v1807_v19  ;;  %v2105_v19 = vld [vmem:[#allocation11 + $0xf0] sm:$0xff]  ;;  %v2104_v23 = vld [vmem:[#allocation11 + $0xe8] sm:$0xff] }
 0x15e   :  { %v1597_v39 = vpop.f32.mrf.mxu1  ;;  %v1558_v40 = vpop.f32.mrf.mxu0 }
 0x15f   :  { %v1598_v41 = vadd.f32 %v1597_v39, %v1557_v38  ;;  %v1559_v35 = vadd.f32 %v1558_v40, %v553_v36  ;;  %v1810_v39 = vsel %vm1773_vm4, %v1800_v18, 0.0  ;;  %v2090_v18 = vld [vmem:[#allocation11 + $0x78] sm:$0xff] }
 0x160   :  { %v1599_v29 = vpop.f32.mrf.mxu1  ;;  %v1560_v33 = vpop.f32.mrf.mxu0 }
 0x161   :  { %v1600_v42 = vadd.f32 %v1599_v29, %v1559_v35  ;;  %v3435_v35 = vmov 269488144  }
 0x162   :  { %v1601_v24 = vpop.f32.mrf.mxu1  ;;  %v1561_v43 = vpop.f32.mrf.mxu0  ;;  %v1822_v29 = vunpack.c.l.s4 %v3435_v35  ;;  %v2134_v35 = vld [vmem:[#allocation11 + $0x1d8] sm:$0xff] }
 0x164   :  { %v1602_v44 = vpop.f32.mrf.mxu1 }
 0x19c   :  { %v1638_v45 = vpop.f32.mrf.mxu0 }
 0x19d   :  { %v3554_v46 = vadd.f32 %v1638_v45, %v1598_v41  ;;  %v1811_v41 = vadd.f32 %v1810_v39, %v1809_v37  ;;  %v2102_v37 = vld [vmem:[#allocation11 + $0xd8] sm:$0xff] }
 0x19e   :  { %v1679_v47 = vpop.f32.mrf.mxu1  ;;  %v1640_v48 = vpop.f32.mrf.mxu0  ;;  %v2086_v39 = vld [vmem:[#allocation11 + $0x58] sm:$0xff] }
 0x19f   :  { %v1641_v61 = vadd.f32 %v1640_v48, %v1600_v42  ;;  %v1680_v2 = vadd.f32 %v1679_v47, %v557_v59  ;;  %v1768_v7 = vmax.f32 %v3554_v46, 0.0  ;;  %v1823_v42 = vunpack.c.0.s8 %v1822_v29  ;;  %v2085_v29 = vld [vmem:[#allocation11 + $0x50] sm:$0xff] }
 0x1a0   :  { %v1681_v50 = vpop.f32.mrf.mxu1  ;;  %v1642_v51 = vpop.f32.mrf.mxu0 }
 0x1a1   :  { %v1769_v3 = vmax.f32 %v1641_v61, 0.0  ;;  %v1682_v8 = vadd.f32 %v1681_v50, %v561_v63  ;;  %v1774_v20 = vsel %vm1773_vm4, %v1768_v7, 0.0  ;;  %v3574_v43 = vsub.s32 %v1823_v42, %v3509_v49  ;;  %v2100_v42 = vld [vmem:[#allocation11 + $0xc8] sm:$0xff] }
 0x1a2   :  { %v1683_v52 = vpop.f32.mrf.mxu1  ;;  %v1643_v53 = vpop.f32.mrf.mxu0 }
 0x1a3   :  { %v1775_v13 = vsel %vm1773_vm4, %v1769_v3, 0.0 }
 0x1a4   :  { %v1684_v54 = vpop.f32.mrf.mxu1  ;;  %v1776_v27 = vadd.f32 %v1775_v13, %v1774_v20  ;;  %v2138_v20 = vld [vmem:[#allocation11 + $0x1f8] sm:$0xff] }
 0x1a5   :  { %2784 = vmatprep.subr.mxu1 %v2138_v20  ;;  %v2092_v20 = vld [vmem:[#allocation11 + $0x88] sm:$0xff] }
 0x1dc   :  { %v1720_v4 = vpop.f32.mrf.mxu0 }
 0x1dd   :  { %v1721_v9 = vadd.f32 %v1720_v4, %v1680_v2 }
 0x1de   :  { %v1761_v11 = vpop.f32.mrf.mxu1  ;;  %v1722_v12 = vpop.f32.mrf.mxu0 }
 0x1df   :  { %v1762_v14 = vadd.f32 %v1761_v11, %v1721_v9  ;;  %v1723_v15 = vadd.f32 %v1722_v12, %v1682_v8 }
 0x1e0   :  { %v1763_v16 = vpop.f32.mrf.mxu1  ;;  %v1724_v17 = vpop.f32.mrf.mxu0 }
 0x1e1   :  { %v1770_v21 = vmax.f32 %v1762_v14, 0.0  ;;  %v1764_v22 = vadd.f32 %v1763_v16, %v1723_v15  ;;  %v2106_v17 = vld [vmem:[#allocation11 + $0xf8] sm:$0xff] }
 0x1e2   :  { %v1765_v25 = vpop.f32.mrf.mxu1  ;;  %v1725_v26 = vpop.f32.mrf.mxu0  ;;  %2749 = vmatprep.subr.mxu0 %v2106_v17  ;;  %v2126_v17 = vld [vmem:[#allocation11 + $0x198] sm:$0xff] }
 0x1e3   :  { %v1771_v28 = vmax.f32 %v1764_v22, 0.0  ;;  %v1777_v30 = vsel %vm1773_vm4, %v1770_v21, 0.0  ;;  %2750 = vmatpush3.msra.mxu0 %v2090_v18  ;;  %v2122_v22 = vld [vmem:[#allocation11 + $0x178] sm:$0xff]  ;;  %v2137_v25 = vld [vmem:[#allocation11 + $0x1f0] sm:$0xff]  ;;  %v2088_v26 = vld [vmem:[#allocation11 + $0x68] sm:$0xff] }
 0x1e4   :  { %v1766_v34 = vpop.f32.mrf.mxu1  ;;  %v1778_v36 = vadd.f32 %v1777_v30, %v1776_v27  ;;  %2751 = vmatprep.subr.mxu0 %v2105_v19  ;;  %2785 = vmatpush3.msra.mxu1 %v2122_v22  ;;  %v2121_v27 = vld [vmem:[#allocation11 + $0x170] sm:$0xff]  ;;  %v2136_v30 = vld [vmem:[#allocation11 + $0x1e8] sm:$0xff]  ;;  %v2110_v19 = vld [vmem:[#allocation11 + $0x118] sm:$0xff] }
 0x1e5   :  { %v1779_v38 = vsel %vm1773_vm4, %v1771_v28, 0.0  ;;  %2786 = vmatprep.subr.mxu1 %v2137_v25  ;;  %v2087_v34 = vld [vmem:[#allocation11 + $0x60] sm:$0xff]  ;;  %v2077_v18 = vld [vmem:[#allocation11 + $0x10] sm:$0xff]  ;;  %v2076_v22 = vld [vmem:[#allocation11 + $0x8] sm:$0xff] }
 0x1e6   :  { %v1780_v40 = vadd.f32 %v1779_v38, %v1778_v36  ;;  %2787 = vmatpush3.msra.mxu1 %v2121_v27  ;;  %v2120_v36 = vld [vmem:[#allocation11 + $0x168] sm:$0xff]  ;;  %v2135_v38 = vld [vmem:[#allocation11 + $0x1e0] sm:$0xff] }
 0x1e7   :  { %2788 = vmatprep.subr.mxu1 %v2136_v30  ;;  %v2091_v25 = vld [vmem:[#allocation11 + $0x80] sm:$0xff] }
 0x1e8   :  { %1781 = vadd.xlane.f32.xlu0 %v1780_v40  ;;  %2789 = vmatpush3.msra.mxu1 %v2120_v36  ;;  %v2119_v40 = vld [vmem:[#allocation11 + $0x160] sm:$0xff] }
 0x1e9   :  { %2790 = vmatprep.subr.mxu1 %v2135_v38  ;;  %v2075_v27 = vld [vmem:[#allocation11] sm:$0xff] }
 0x1ea   :  { %2791 = vmatpush3.msra.mxu1 %v2119_v40  ;;  %v2123_v30 = vld [vmem:[#allocation11 + $0x180] sm:$0xff] }
 0x1eb   :  { %2792 = vmatprep.subr.mxu1 %v2134_v35  ;;  %v2107_v36 = vld [vmem:[#allocation11 + $0x100] sm:$0xff]  ;;  %v1935_v35 = vsub.s32 3, %v3509_v49 }
 0x1ec   :  { %1812 = vadd.xlane.f32.xlu0 %v1811_v41  ;;  %v2101_v41 = vld [vmem:[#allocation11 + $0xd0] sm:$0xff] }
 0x271   :  { %v1782_v33 = vpop.xlane.xlu0 %1781 }
 0x275   :  { %v1813_v24 = vpop.xlane.xlu0 %1812 }
 0x276   :  { %v1814_v44 = vadd.f32 %v1813_v24, %v1782_v33  ;;  %v2118_v33 = vld [vmem:[#allocation11 + $0x158] sm:$0xff]  ;;  %v2133_v24 = vld [vmem:[#allocation11 + $0x1d0] sm:$0xff] }
 0x277   :  { %2793 = vmatpush3.msra.mxu1 %v2118_v33  ;;  %v1974_v33 = vsub.s32 4, %v3509_v49 }
 0x278   :  { %v1815_v45 = vmul.f32 0.0009765625, %v1814_v44  ;;  %v2084_v44 = vld [vmem:[#allocation11 + $0x48] sm:$0xff]  ;;  %2794 = vmatprep.subr.mxu1 %v2133_v24  ;;  %v1944_v24 = vrot.slane %v3556_v56, %v1935_v35 }
 0x27a   :  { %v1827_v46 = vrot.slane %v1815_v45, %v3574_v43  ;;  %v3577_v47 = vsub.f32 %v1768_v7, %v1815_v45  ;;  %v3579_v48 = vsub.f32 %v1769_v3, %v1815_v45  ;;  %v3581_v50 = vsub.f32 %v1770_v21, %v1815_v45  ;;  %v2089_v21 = vld [vmem:[#allocation11 + $0x70] sm:$0xff] }
 0x27b   :  { %v3583_v51 = vsub.f32 %v1771_v28, %v1815_v45  ;;  %2752 = vmatpush3.msra.mxu0 %v2089_v21  ;;  %v2103_v28 = vld [vmem:[#allocation11 + $0xe0] sm:$0xff]  ;;  %v2117_v45 = vld [vmem:[#allocation11 + $0x150] sm:$0xff] }
 0x27c   :  { %v1830_v52 = vmul.f32 %v3577_v47, %v3577_v47  ;;  %v1831_v53 = vmul.f32 %v3579_v48, %v3579_v48  ;;  %v1832_v54 = vmul.f32 %v3581_v50, %v3581_v50  ;;  %v3591_v57 = vsub.f32 %v1772_v55, %v1827_v46  ;;  %2753 = vmatprep.subr.mxu0 %v2104_v23  ;;  %v2099_v46 = vld [vmem:[#allocation11 + $0xc0] sm:$0xff]  ;;  %v2125_v21 = vld [vmem:[#allocation11 + $0x190] sm:$0xff] }
 0x27d   :  { %v1833_v59 = vmul.f32 %v3583_v51, %v3583_v51  ;;  %2754 = vmatpush3.msra.mxu0 %v2088_v26  ;;  %2795 = vmatpush3.msra.mxu1 %v2117_v45  ;;  %v2109_v23 = vld [vmem:[#allocation11 + $0x110] sm:$0xff]  ;;  %v2124_v26 = vld [vmem:[#allocation11 + $0x188] sm:$0xff]  ;;  %v1936_v45 = vrot.slane %v3548_v31, %v1935_v35 }
 0x27e   :  { %v1834_v61 = vsel %vm1773_vm4, %v1830_v52, 0.0  ;;  %v1835_v62 = vsel %vm1773_vm4, %v1831_v53, 0.0  ;;  %v1843_v63 = vmul.f32 %v3591_v57, %v3591_v57  ;;  %v1837_v2 = vsel %vm1773_vm4, %v1832_v54, 0.0  ;;  %2755 = vmatprep.subr.mxu0 %v2103_v28  ;;  %v2132_v52 = vld [vmem:[#allocation11 + $0x1c8] sm:$0xff]  ;;  %v2083_v53 = vld [vmem:[#allocation11 + $0x40] sm:$0xff] }
 0x27f   :  { %v1836_v1 = vadd.f32 %v1835_v62, %v1834_v61  ;;  %v1839_v55 = vsel %vm1773_vm4, %v1833_v59, 0.0  ;;  %2756 = vmatpush3.msra.mxu0 %v2087_v34  ;;  %v2116_v54 = vld [vmem:[#allocation11 + $0x148] sm:$0xff]  ;;  %v2098_v59 = vld [vmem:[#allocation11 + $0xb8] sm:$0xff]  ;;  %v2131_v61 = vld [vmem:[#allocation11 + $0x1c0] sm:$0xff]  ;;  %2796 = vmatprep.subr.mxu1 %v2132_v52  ;;  %v1983_v52 = vrot.slane %v3556_v56, %v1974_v33 }
 0x280   :  { %v1845_v3 = vcombine.high %v1843_v63, %v1843_v63  ;;  %v1852_v4 = vrot.slane %v1843_v63, %v3512_v60  ;;  %2757 = vmatprep.subr.mxu0 %v2102_v37  ;;  %v2082_v62 = vld [vmem:[#allocation11 + $0x38] sm:$0xff]  ;;  %v2115_v63 = vld [vmem:[#allocation11 + $0x140] sm:$0xff]  ;;  %2797 = vmatpush3.msra.mxu1 %v2116_v54  ;;  %v2108_v28 = vld [vmem:[#allocation11 + $0x108] sm:$0xff]  ;;  %v1975_v54 = vrot.slane %v3548_v31, %v1974_v33 }
 0x281   :  { %v1838_v5 = vadd.f32 %v1837_v2, %v1836_v1  ;;  %2758 = vmatpush3.msra.mxu0 %v2086_v39  ;;  %v2097_v1 = vld [vmem:[#allocation11 + $0xb0] sm:$0xff]  ;;  %v2130_v2 = vld [vmem:[#allocation11 + $0x1b8] sm:$0xff]  ;;  %2798 = vmatprep.subr.mxu1 %v2131_v61 }
 0x282   :  { %v1859_v6 = vrot.slane %v1845_v3, %v3512_v60  ;;  %v1860_v7 = vcombine.high %v1852_v4, %v1852_v4  ;;  %v1866_v10 = vsel %vm1773_vm4, %v1852_v4, 0.0  ;;  %2759 = vmatprep.subr.mxu0 %v2101_v41  ;;  %v2081_v3 = vld [vmem:[#allocation11 + $0x30] sm:$0xff]  ;;  %v2114_v4 = vld [vmem:[#allocation11 + $0x138] sm:$0xff]  ;;  %2799 = vmatpush3.msra.mxu1 %v2115_v63 }
 0x283   :  { %v1840_v8 = vadd.f32 %v1839_v55, %v1838_v5  ;;  %2760 = vmatpush3.msra.mxu0 %v2085_v29  ;;  %v2096_v5 = vld [vmem:[#allocation11 + $0xa8] sm:$0xff]  ;;  %v2129_v55 = vld [vmem:[#allocation11 + $0x1b0] sm:$0xff]  ;;  %2800 = vmatprep.subr.mxu1 %v2130_v2  ;;  %v2042_v34 = vld [vmem:[#allocation9 + $0xf8] sm:$0xff] }
 0x284   :  { %v1861_v9 = vcombine.high %v1859_v6, %v1859_v6  ;;  %v1867_v11 = vsel %vm1773_vm4, %v1860_v7, 0.0  ;;  %v1869_v13 = vsel %vm1773_vm4, %v1859_v6, 0.0  ;;  %2761 = vmatprep.subr.mxu0 %v2100_v42  ;;  %v2080_v6 = vld [vmem:[#allocation11 + $0x28] sm:$0xff]  ;;  %v2113_v7 = vld [vmem:[#allocation11 + $0x130] sm:$0xff]  ;;  %2801 = vmatpush3.msra.mxu1 %v2114_v4  ;;  %v2074_v37 = vld [vmem:[#allocation9 + $0x1f8] sm:$0xff]  ;;  %v1940_v42 = vrot.slane %v3550_v32, %v1935_v35 }
 0x285   :  { %1841 = vadd.xlane.f32.xlu1 %v1840_v8  ;;  %v1868_v12 = vadd.f32 %v1867_v11, %v1866_v10  ;;  %2762 = vmatpush3.msra.mxu0 %v2084_v44  ;;  %v2095_v8 = vld [vmem:[#allocation11 + $0xa0] sm:$0xff]  ;;  %v2112_v11 = vld [vmem:[#allocation11 + $0x128] sm:$0xff]  ;;  %v1948_v44 = vrot.slane %v3559_v58, %v1935_v35 }
 0x286   :  { %v1871_v15 = vsel %vm1773_vm4, %v1861_v9, 0.0  ;;  %2763 = vmatprep.subr.mxu0 %v2099_v46  ;;  %v2128_v9 = vld [vmem:[#allocation11 + $0x1a8] sm:$0xff]  ;;  %2802 = vmatprep.subr.mxu1 %v2129_v55  ;;  %v2079_v10 = vld [vmem:[#allocation11 + $0x20] sm:$0xff]  ;;  %v1979_v46 = vrot.slane %v3550_v32, %v1974_v33 }
 0x287   :  { %v1870_v14 = vadd.f32 %v1869_v13, %v1868_v12  ;;  %2764 = vmatpush3.msra.mxu0 %v2083_v53  ;;  %2803 = vmatpush3.msra.mxu1 %v2113_v7  ;;  %v2094_v12 = vld [vmem:[#allocation11 + $0x98] sm:$0xff]  ;;  %v2127_v13 = vld [vmem:[#allocation11 + $0x1a0] sm:$0xff]  ;;  %v1987_v53 = vrot.slane %v3559_v58, %v1974_v33  ;;  %v1954_v61 = vcombine.low %v1944_v24, %v1948_v44  ;;  %v3626_v7 = vsub.s32 1, %v3509_v49  ;;  %v2036_v44 = vld [vmem:[#allocation9 + $0xc8] sm:$0xff] }
 0x288   :  { %2765 = vmatprep.subr.mxu0 %v2098_v59  ;;  %2804 = vmatprep.subr.mxu1 %v2128_v9  ;;  %v1953_v59 = vcombine.low %v1936_v45, %v1940_v42  ;;  %v2055_v35 = vld [vmem:[#allocation9 + $0x160] sm:$0xff]  ;;  %v2070_v33 = vld [vmem:[#allocation9 + $0x1d8] sm:$0xff]  ;;  %v2021_v42 = vld [vmem:[#allocation9 + $0x50] sm:$0xff] }
 0x289   :  { %v1872_v16 = vadd.f32 %v1871_v15, %v1870_v14  ;;  %2766 = vmatpush3.msra.mxu0 %v2082_v62  ;;  %v2078_v14 = vld [vmem:[#allocation11 + $0x18] sm:$0xff]  ;;  %v2111_v15 = vld [vmem:[#allocation11 + $0x120] sm:$0xff]  ;;  %2805 = vmatpush3.msra.mxu1 %v2112_v11  ;;  %v1992_v62 = vcombine.low %v1975_v54, %v1979_v46  ;;  %v1993_v63 = vcombine.low %v1983_v52, %v1987_v53  ;;  %v2069_v45 = vld [vmem:[#allocation9 + $0x1d0] sm:$0xff] }
 0x28a   :  { %2767 = vmatprep.subr.mxu0 %v2097_v1  ;;  %2806 = vmatprep.subr.mxu1 %v2127_v13  ;;  %v1961_v1 = vrot.slane %v1953_v59, %v3512_v60  ;;  %v1968_v2 = vrot.slane %v1954_v61, %v3512_v60  ;;  %v3634_v13 = vsub.s32 2, %v3509_v49  ;;  %v2054_v24 = vld [vmem:[#allocation9 + $0x158] sm:$0xff]  ;;  %v2020_v46 = vld [vmem:[#allocation9 + $0x48] sm:$0xff]  ;;  %v2053_v52 = vld [vmem:[#allocation9 + $0x150] sm:$0xff] }
 0x28b   :  { %1873 = vadd.xlane.f32.xlu1 %v1872_v16  ;;  %2768 = vmatpush3.msra.mxu0 %v2081_v3  ;;  %v2093_v16 = vld [vmem:[#allocation11 + $0x90] sm:$0xff]  ;;  %v2000_v3 = vrot.slane %v1992_v62, %v3512_v60  ;;  %v2007_v4 = vrot.slane %v1993_v63, %v3512_v60  ;;  %v2035_v53 = vld [vmem:[#allocation9 + $0xc0] sm:$0xff]  ;;  %v2068_v54 = vld [vmem:[#allocation9 + $0x1c8] sm:$0xff] }
 0x28c   :  { %2769 = vmatprep.subr.mxu0 %v2096_v5  ;;  %2807 = vmatpush3.msra.mxu1 %v2111_v15  ;;  %v2019_v59 = vld [vmem:[#allocation9 + $0x40] sm:$0xff]  ;;  %v2052_v61 = vld [vmem:[#allocation9 + $0x148] sm:$0xff]  ;;  %v2034_v62 = vld [vmem:[#allocation9 + $0xb8] sm:$0xff] }
 0x28d   :  { %2770 = vmatpush3.msra.mxu0 %v2080_v6  ;;  %2808 = vmatprep.subr.mxu1 %v2126_v17  ;;  %v1969_v6 = vcombine.low %v1961_v1, %v1968_v2  ;;  %v2008_v9 = vcombine.low %v2000_v3, %v2007_v4  ;;  %v2067_v63 = vld [vmem:[#allocation9 + $0x1c0] sm:$0xff]  ;;  %v2018_v1 = vld [vmem:[#allocation9 + $0x38] sm:$0xff]  ;;  %v2033_v3 = vld [vmem:[#allocation9 + $0xb0] sm:$0xff] }
 0x28e   :  { %2771 = vmatprep.subr.mxu0 %v2095_v8  ;;  %2809 = vmatpush3.msra.mxu1 %v2110_v19  ;;  %v2051_v2 = vld [vmem:[#allocation9 + $0x140] sm:$0xff]  ;;  %v2066_v4 = vld [vmem:[#allocation9 + $0x1b8] sm:$0xff] }
 0x28f   :  { %2772 = vmatpush3.msra.mxu0 %v2079_v10  ;;  %2810 = vmatprep.subr.mxu1 %v2125_v21 }
 0x290   :  { %2773 = vmatprep.subr.mxu0 %v2094_v12  ;;  %2811 = vmatpush3.msra.mxu1 %v2109_v23  ;;  %v1890_v12 = vrot.slane %v3550_v32, %v3626_v7 }
 0x291   :  { %2774 = vmatpush3.msra.mxu0 %v2078_v14  ;;  %2812 = vmatprep.subr.mxu1 %v2124_v26  ;;  %v2025_v26 = vld [vmem:[#allocation9 + $0x70] sm:$0xff] }
 0x292   :  { %2775 = vmatprep.subr.mxu0 %v2093_v16  ;;  %2813 = vmatpush3.msra.mxu1 %v2108_v28  ;;  %v2040_v28 = vld [vmem:[#allocation9 + $0xe8] sm:$0xff] }
 0x293   :  { %2776 = vmatpush3.msra.mxu0 %v2077_v18  ;;  %2814 = vmatprep.subr.mxu1 %v2123_v30  ;;  %v2024_v30 = vld [vmem:[#allocation9 + $0x68] sm:$0xff] }
 0x294   :  { %2777 = vmatprep.subr.mxu0 %v2092_v20  ;;  %2815 = vmatpush3.msra.mxu1 %v2107_v36  ;;  %v2026_v20 = vld [vmem:[#allocation9 + $0x78] sm:$0xff]  ;;  %v2039_v36 = vld [vmem:[#allocation9 + $0xe0] sm:$0xff] }
 0x295   :  { %2778 = vmatpush3.msra.mxu0 %v2076_v22  ;;  %2854 = vmatprep.subr.mxu1 %v2074_v37  ;;  %v2041_v22 = vld [vmem:[#allocation9 + $0xf0] sm:$0xff]  ;;  %v2072_v37 = vld [vmem:[#allocation9 + $0x1e8] sm:$0xff] }
 0x296   :  { %2779 = vmatprep.subr.mxu0 %v2091_v25  ;;  %v1918_v25 = vrot.slane %v3559_v58, %v3634_v13 }
 0x297   :  { %2780 = vmatpush3.msra.mxu0 %v2075_v27  ;;  %v2058_v27 = vld [vmem:[#allocation9 + $0x178] sm:$0xff] }
 0x298   :  { %2819 = vmatprep.subr.mxu0 %v2042_v34  ;;  %v2057_v34 = vld [vmem:[#allocation9 + $0x170] sm:$0xff] }
 0x30e   :  { %v1842_v38 = vpop.xlane.xlu1 %1841 }
 0x314   :  { %v1874_v39 = vpop.xlane.xlu1 %1873 }
 0x315   :  { %v1875_v40 = vadd.f32 %v1874_v39, %v1842_v38  ;;  %v2056_v38 = vld [vmem:[#allocation9 + $0x168] sm:$0xff]  ;;  %v2038_v39 = vld [vmem:[#allocation9 + $0xd8] sm:$0xff] }
 0x317   :  { %v1876_v41 = vmul.f32 0.0009765625, %v1875_v40  ;;  %v2071_v40 = vld [vmem:[#allocation9 + $0x1e0] sm:$0xff] }
 0x319   :  { %v1877_v29 = vadd.f32 1e-05, %v1876_v41  ;;  %v2022_v41 = vld [vmem:[#allocation9 + $0x58] sm:$0xff] }
 0x31b   :  { %3248 = vrsqrt.f32 %v1877_v29  ;;  %v2037_v29 = vld [vmem:[#allocation9 + $0xd0] sm:$0xff] }
 0x328   :  { %v3621_v5 = vpop.eup %3248 }
 0x329   :  { %v1930_v55 = vrot.slane %v3621_v5, %v3574_v43  ;;  %v1880_v11 = vmul.f32 %v3621_v5, %v3579_v48  ;;  %v1882_v16 = vmul.f32 %v3621_v5, %v3583_v51  ;;  %v1910_v48 = vrot.slane %v3550_v32, %v3634_v13  ;;  %v2073_v32 = vld [vmem:[#allocation9 + $0x1f0] sm:$0xff] }
 0x32b   :  { %v1932_v8 = vmul.f32 %v1930_v55, %v3591_v57  ;;  %v1898_v57 = vrot.slane %v3559_v58, %v3626_v7  ;;  %v1900_v17 = vmul.f32 %v1890_v12, %v1880_v11  ;;  %v2023_v58 = vld [vmem:[#allocation9 + $0x60] sm:$0xff]  ;;  %v2017_v55 = vld [vmem:[#allocation9 + $0x30] sm:$0xff] }
 0x32c   :  { %v2049_v11 = vld [vmem:[#allocation9 + $0x130] sm:$0xff]  ;;  %v2031_v12 = vld [vmem:[#allocation9 + $0xa0] sm:$0xff] }
 0x32d   :  { %v1971_v10 = vmul.f32 %v1969_v6, %v1932_v8  ;;  %v1902_v23 = vmul.f32 %v1898_v57, %v1882_v16  ;;  %v1920_v51 = vadd.f32 %v1910_v48, %v1900_v17  ;;  %v2050_v6 = vld [vmem:[#allocation9 + $0x138] sm:$0xff]  ;;  %v2032_v8 = vld [vmem:[#allocation9 + $0xa8] sm:$0xff]  ;;  %v2063_v57 = vld [vmem:[#allocation9 + $0x1a0] sm:$0xff] }
 0x32e   :  { %v2030_v16 = vld [vmem:[#allocation9 + $0x98] sm:$0xff]  ;;  %v2047_v48 = vld [vmem:[#allocation9 + $0x120] sm:$0xff] }
 0x32f   :  { %v2010_v14 = vadd.f32 %v2008_v9, %v1971_v10  ;;  %v2065_v9 = vld [vmem:[#allocation9 + $0x1b0] sm:$0xff]  ;;  %v2016_v10 = vld [vmem:[#allocation9 + $0x28] sm:$0xff]  ;;  %v2014_v17 = vld [vmem:[#allocation9 + $0x18] sm:$0xff] }
 0x331   :  { %v2147_v43 = vrot.slane %v2010_v14, %v3512_v60  ;;  %v2140_v15 = vcombine.high %v2010_v14, %v2010_v14  ;;  %v2064_v14 = vld [vmem:[#allocation9 + $0x1a8] sm:$0xff] }
 0x333   :  { %v2155_v18 = vcombine.high %v2147_v43, %v2147_v43  ;;  %v2154_v19 = vrot.slane %v2140_v15, %v3512_v60  ;;  %v1922_v60 = vadd.f32 %v1918_v25, %v1902_v23  ;;  %v2048_v15 = vld [vmem:[#allocation9 + $0x128] sm:$0xff]  ;;  %v2046_v23 = vld [vmem:[#allocation9 + $0x118] sm:$0xff]  ;;  %v1881_v25 = vmul.f32 %v3621_v5, %v3581_v50  ;;  %v2011_v50 = vld [vmem:[#allocation9] sm:$0xff] }
 0x335   :  { %2225 = vmatprep.mubr.f32.mxu0 %v2155_v18  ;;  %v2156_v21 = vcombine.high %v2154_v19, %v2154_v19  ;;  %v1879_v18 = vmul.f32 %v3621_v5, %v3577_v47  ;;  %v2028_v47 = vld [vmem:[#allocation9 + $0x88] sm:$0xff] }
 0x336   :  { %2226 = vmatmul.mubr.f32.vlgmr.msra.gmra.mxu0 %v2147_v43  ;;  %v2015_v43 = vld [vmem:[#allocation9 + $0x20] sm:$0xff]  ;;  %v2044_v5 = vld [vmem:[#allocation9 + $0x108] sm:$0xff] }
 0x337   :  { %2820 = vmatpush3.msra.mxu0 %v2026_v20  ;;  %2295 = vmatprep.mubr.f32.mxu1 %v2156_v21  ;;  %v2029_v20 = vld [vmem:[#allocation9 + $0x90] sm:$0xff]  ;;  %v2062_v21 = vld [vmem:[#allocation9 + $0x198] sm:$0xff] }
 0x338   :  { %2821 = vmatprep.subr.mxu0 %v2041_v22  ;;  %2365 = vmatprep.mubr.f32.mxu0 %v1920_v51  ;;  %v2013_v22 = vld [vmem:[#allocation9 + $0x10] sm:$0xff]  ;;  %v1894_v51 = vrot.slane %v3556_v56, %v3626_v7 }
 0x339   :  { %2296 = vmatmul.mubr.f32.vlgmr.msra.gmra.mxu1 %v2154_v19  ;;  %2822 = vmatpush3.msra.mxu0 %v2025_v26  ;;  %v1886_v19 = vrot.slane %v3548_v31, %v3626_v7  ;;  %v2061_v26 = vld [vmem:[#allocation9 + $0x190] sm:$0xff] }
 0x33a   :  { %2855 = vmatpush3.msra.mxu1 %v2058_v27  ;;  %2823 = vmatprep.subr.mxu0 %v2040_v28  ;;  %v2012_v27 = vld [vmem:[#allocation9 + $0x8] sm:$0xff]  ;;  %v2045_v28 = vld [vmem:[#allocation9 + $0x110] sm:$0xff]  ;;  %v1901_v7 = vmul.f32 %v1894_v51, %v1881_v25 }
 0x33b   :  { %2856 = vmatprep.subr.mxu1 %v2073_v32  ;;  %2435 = vmatprep.mubr.f32.mxu1 %v1922_v60  ;;  %v1899_v32 = vmul.f32 %v1886_v19, %v1879_v18  ;;  %v1906_v60 = vrot.slane %v3548_v31, %v3634_v13 }
 0x33c   :  { %2824 = vmatpush3.msra.mxu0 %v2024_v30  ;;  %2857 = vmatpush3.msra.mxu1 %v2057_v34  ;;  %v2027_v30 = vld [vmem:[#allocation9 + $0x80] sm:$0xff]  ;;  %v2060_v34 = vld [vmem:[#allocation9 + $0x188] sm:$0xff] }
 0x33d   :  { %2825 = vmatprep.subr.mxu0 %v2039_v36  ;;  %2858 = vmatprep.subr.mxu1 %v2072_v37  ;;  %v1914_v36 = vrot.slane %v3556_v56, %v3634_v13  ;;  %v2059_v37 = vld [vmem:[#allocation9 + $0x180] sm:$0xff]  ;;  %v2460_v56 = vld [vmem:[#allocation12 + $0x68] sm:$0xff] }
 0x33e   :  { %2826 = vmatpush3.msra.mxu0 %v2023_v58  ;;  %2859 = vmatpush3.msra.mxu1 %v2056_v38  ;;  %v1919_v58 = vadd.f32 %v1906_v60, %v1899_v32  ;;  %v2043_v38 = vld [vmem:[#allocation9 + $0x100] sm:$0xff] }
 0x33f   :  { %2827 = vmatprep.subr.mxu0 %v2038_v39  ;;  %2860 = vmatprep.subr.mxu1 %v2071_v40  ;;  %v1921_v39 = vadd.f32 %v1914_v36, %v1901_v7  ;;  %v2462_v40 = vld [vmem:[#allocation12 + $0x78] sm:$0xff]  ;;  %v2459_v13 = vld [vmem:[#allocation12 + $0x60] sm:$0xff] }
 0x340   :  { %2828 = vmatpush3.msra.mxu0 %v2022_v41  ;;  %2861 = vmatpush3.msra.mxu1 %v2055_v35  ;;  %v2461_v41 = vld [vmem:[#allocation12 + $0x70] sm:$0xff]  ;;  %v2458_v35 = vld [vmem:[#allocation12 + $0x58] sm:$0xff] }
 0x341   :  { %2829 = vmatprep.subr.mxu0 %v2037_v29  ;;  %2862 = vmatprep.subr.mxu1 %v2070_v33  ;;  %v2457_v29 = vld [vmem:[#allocation12 + $0x50] sm:$0xff]  ;;  %v2456_v33 = vld [vmem:[#allocation12 + $0x48] sm:$0xff] }
 0x342   :  { %2830 = vmatpush3.msra.mxu0 %v2021_v42  ;;  %2863 = vmatpush3.msra.mxu1 %v2054_v24  ;;  %v2455_v42 = vld [vmem:[#allocation12 + $0x40] sm:$0xff]  ;;  %v2454_v24 = vld [vmem:[#allocation12 + $0x38] sm:$0xff] }
 0x343   :  { %2831 = vmatprep.subr.mxu0 %v2036_v44  ;;  %2864 = vmatprep.subr.mxu1 %v2069_v45  ;;  %v2453_v44 = vld [vmem:[#allocation12 + $0x30] sm:$0xff]  ;;  %v2452_v45 = vld [vmem:[#allocation12 + $0x28] sm:$0xff] }
 0x344   :  { %2832 = vmatpush3.msra.mxu0 %v2020_v46  ;;  %2865 = vmatpush3.msra.mxu1 %v2053_v52  ;;  %v2451_v46 = vld [vmem:[#allocation12 + $0x20] sm:$0xff]  ;;  %v2450_v52 = vld [vmem:[#allocation12 + $0x18] sm:$0xff] }
 0x345   :  { %2833 = vmatprep.subr.mxu0 %v2035_v53  ;;  %2866 = vmatprep.subr.mxu1 %v2068_v54  ;;  %v2449_v53 = vld [vmem:[#allocation12 + $0x10] sm:$0xff]  ;;  %v2448_v54 = vld [vmem:[#allocation12 + $0x8] sm:$0xff] }
 0x346   :  { %2834 = vmatpush3.msra.mxu0 %v2019_v59  ;;  %2867 = vmatpush3.msra.mxu1 %v2052_v61  ;;  %v2447_v59 = vld [vmem:[#allocation12] sm:$0xff] }
 0x347   :  { %2835 = vmatprep.subr.mxu0 %v2034_v62  ;;  %2868 = vmatprep.subr.mxu1 %v2067_v63 }
 0x348   :  { %2836 = vmatpush3.msra.mxu0 %v2018_v1  ;;  %2869 = vmatpush3.msra.mxu1 %v2051_v2 }
 0x349   :  { %2837 = vmatprep.subr.mxu0 %v2033_v3  ;;  %2870 = vmatprep.subr.mxu1 %v2066_v4 }
 0x34a   :  { %2838 = vmatpush3.msra.mxu0 %v2017_v55  ;;  %2871 = vmatpush3.msra.mxu1 %v2050_v6  ;;  %v2443_v55 = vsub.s32 5, %v3509_v49 }
 0x34b   :  { %2839 = vmatprep.subr.mxu0 %v2032_v8  ;;  %2872 = vmatprep.subr.mxu1 %v2065_v9 }
 0x34c   :  { %2840 = vmatpush3.msra.mxu0 %v2016_v10  ;;  %2873 = vmatpush3.msra.mxu1 %v2049_v11 }
 0x34d   :  { %2841 = vmatprep.subr.mxu0 %v2031_v12  ;;  %2874 = vmatprep.subr.mxu1 %v2064_v14 }
 0x34e   :  { %2842 = vmatpush3.msra.mxu0 %v2015_v43  ;;  %2875 = vmatpush3.msra.mxu1 %v2048_v15  ;;  %v2444_v43 = vrot.slane %v3548_v31, %v2443_v55 }
 0x34f   :  { %2843 = vmatprep.subr.mxu0 %v2030_v16  ;;  %2876 = vmatprep.subr.mxu1 %v2063_v57  ;;  %v2465_v57 = vsub.s32 6, %v3509_v49 }
 0x350   :  { %2844 = vmatpush3.msra.mxu0 %v2014_v17  ;;  %2877 = vmatpush3.msra.mxu1 %v2047_v48 }
 0x351   :  { %2845 = vmatprep.subr.mxu0 %v2029_v20  ;;  %2878 = vmatprep.subr.mxu1 %v2062_v21  ;;  %v2466_v17 = vrot.slane %v3548_v31, %v2465_v57 }
 0x352   :  { %2846 = vmatpush3.msra.mxu0 %v2013_v22  ;;  %2879 = vmatpush3.msra.mxu1 %v2046_v23 }
 0x353   :  { %2847 = vmatprep.subr.mxu0 %v2028_v47  ;;  %2880 = vmatprep.subr.mxu1 %v2061_v26 }
 0x354   :  { %2848 = vmatpush3.msra.mxu0 %v2012_v27  ;;  %2881 = vmatpush3.msra.mxu1 %v2045_v28 }
 0x355   :  { %2849 = vmatprep.subr.mxu0 %v2027_v30  ;;  %2882 = vmatprep.subr.mxu1 %v2060_v34 }
 0x356   :  { %2850 = vmatpush3.msra.mxu0 %v2011_v50  ;;  %2883 = vmatpush3.msra.mxu1 %v2044_v5 }
 0x357   :  { %2366 = vmatmul.mubr.f32.vlgmr.msra.gmra.mxu0 %v1919_v58  ;;  %2884 = vmatprep.subr.mxu1 %v2059_v37 }
 0x358   :  { %2885 = vmatpush3.msra.mxu1 %v2043_v38  ;;  %2906 = vmatprep.subr.mxu0 %v3433_v0 }
 0x359   :  { %2436 = vmatmul.mubr.f32.vlgmr.msra.gmra.mxu1 %v1921_v39  ;;  %2907 = vmatpush3.msra.mxu0 %v2462_v40 }
 0x35a   :  { %2908 = vmatprep.subr.mxu0 %v3433_v0  ;;  %2938 = vmatprep.mubr.msk.f32.mxu0 %vm3436_vm5, %v3433_v0 }
 0x35b   :  { %2909 = vmatpush3.msra.mxu0 %v2461_v41 }
 0x35c   :  { %2910 = vmatprep.subr.mxu0 %v3433_v0 }
 0x35d   :  { %2911 = vmatpush3.msra.mxu0 %v2460_v56 }
 0x35e   :  { %2912 = vmatprep.subr.mxu0 %v3433_v0 }
 0x35f   :  { %2913 = vmatpush3.msra.mxu0 %v2459_v13 }
 0x360   :  { %2914 = vmatprep.subr.mxu0 %v3433_v0 }
 0x361   :  { %2915 = vmatpush3.msra.mxu0 %v2458_v35 }
 0x362   :  { %2916 = vmatprep.subr.mxu0 %v3433_v0 }
 0x363   :  { %2917 = vmatpush3.msra.mxu0 %v2457_v29 }
 0x364   :  { %2918 = vmatprep.subr.mxu0 %v3433_v0 }
 0x365   :  { %2919 = vmatpush3.msra.mxu0 %v2456_v33 }
 0x366   :  { %2920 = vmatprep.subr.mxu0 %v3433_v0 }
 0x367   :  { %2921 = vmatpush3.msra.mxu0 %v2455_v42 }
 0x368   :  { %2922 = vmatprep.subr.mxu0 %v3433_v0 }
 0x369   :  { %2923 = vmatpush3.msra.mxu0 %v2454_v24 }
 0x36a   :  { %2924 = vmatprep.subr.mxu0 %v3433_v0 }
 0x36b   :  { %2925 = vmatpush3.msra.mxu0 %v2453_v44 }
 0x36c   :  { %2926 = vmatprep.subr.mxu0 %v3433_v0 }
 0x36d   :  { %2927 = vmatpush3.msra.mxu0 %v2452_v45 }
 0x36e   :  { %2928 = vmatprep.subr.mxu0 %v3433_v0 }
 0x36f   :  { %2929 = vmatpush3.msra.mxu0 %v2451_v46 }
 0x370   :  { %2930 = vmatprep.subr.mxu0 %v3433_v0 }
 0x371   :  { %2931 = vmatpush3.msra.mxu0 %v2450_v52 }
 0x372   :  { %2932 = vmatprep.subr.mxu0 %v3433_v0 }
 0x373   :  { %2933 = vmatpush3.msra.mxu0 %v2449_v53 }
 0x374   :  { %2934 = vmatprep.subr.mxu0 %v3433_v0 }
 0x375   :  { %2935 = vmatpush3.msra.mxu0 %v2448_v54 }
 0x376   :  { %2936 = vmatprep.subr.mxu0 %v3433_v0 }
 0x377   :  { %2937 = vmatpush3.msra.mxu0 %v2447_v59 }
 0x3f6   :  { %v2781_v62 = vpop.f32.mrf.mxu0 }
 0x3f8   :  { %v2782_v1 = vpop.f32.mrf.mxu0 }
 0x3f9   :  { %v2816_v61 = vpop.f32.mrf.mxu1  ;;  %v2783_v4 = vadd.f32 %v2782_v1, %v2781_v62 }
 0x3fb   :  { %v2817_v63 = vpop.f32.mrf.mxu1 }
 0x3fc   :  { %v2818_v2 = vadd.f32 %v2817_v63, %v2816_v61 }
 0x3fe   :  { %v2298_v9 = vadd.f32 %v2818_v2, %v2783_v4 }
 0x417   :  { %v2851_v3 = vpop.f32.mrf.mxu0 }
 0x419   :  { %v2852_v6 = vpop.f32.mrf.mxu0  ;;  %v2886_v8 = vpop.f32.mrf.mxu1 }
 0x41a   :  { %v2853_v10 = vadd.f32 %v2852_v6, %v2851_v3 }
 0x41b   :  { %v2887_v11 = vpop.f32.mrf.mxu1 }
 0x41c   :  { %v2368_v12 = vadd.f32 %v2853_v10, %v2298_v9  ;;  %v2888_v14 = vadd.f32 %v2887_v11, %v2886_v8 }
 0x41e   :  { %v2438_v15 = vadd.f32 %v2888_v14, %v2368_v12 }
 0x420   :  { %v2445_v0 = vadd.f32 %v2444_v43, %v2438_v15 }
 0x422   :  { %v2446_v16 = vmax.f32 %v2445_v0, 0.0 }
 0x424   :  { %2939 = vmatmul.mubr.f32.vlgmr.msra.gmra.mxu0 %v2446_v16 }
 0x4e4   :  { %v2533_v48 = vpop.f32.mrf.mxu0 }
 0x4e5   :  { %v2534_v18 = vadd.f32 %v2533_v48, %v2466_v17 }
 0x4e6   :  { %v2940_v19 = vpop.f32.mrf.mxu0 }
 0x4e7   :  { %v2537_v20 = vmax.f32 %v2534_v18, 0.0 }
 0x4e9   :  { %2538 = vst [vmem:[#allocation15] sm:$0x3] %v2537_v20 }
 0x4ea   :  { %3401 = shalt.err (!%p3398_p11)
}
 0x4eb   :  { %2548 = dma.vmem_to_hbm [thread:$0]  %s2546_s6, 32, %s3689_s7, [#allocation5]  }
 0x4ec   :  { %3418 = dma.done.wait [#allocation5], 32  }
 0x4ed   :  { %3419 = vsyncadd [#allocation5], 4294967264 }
 0x4ee   :  { %2552 = vsyncpa [#allocation4], 1 }
 0x4ef   :  { %2553 = vsyncpa [#allocation7], 1 }
 0x4f0   :  { %2554 = vsyncpa [#allocation10], 1 }
 0x4f1   :  { %2555 = vsyncpa [#allocation13], 1 }
 0x4f2   :  { %2556 = vsyncpa [#allocation5], 1 }

</bundles_post_ra>
